<compile_context>
chip_gen: v5e
topology: v5e:2x2
jax: 0.10.0
libtpu: 0.0.40
codegen_flags: <defaults>
</compile_context>

<pallas_src>
import functools

import jax
import jax.numpy as jnp
from jax.experimental import pallas as pl
from jax.experimental.pallas import tpu as pltpu


def _fused_conv_bn_relu_kernel(x_ref, w_ref, b_ref, o_ref, *, kh, kw, stride,
                               dilation, h_out, w_out, relu):
    """One grid step = one image.

    x_ref: (H_pad, W_pad, C_in)     bf16  padded NHWC image (VMEM resident)
    w_ref: (KH*KW, C_out, C_in)     bf16  BN-scale-folded conv weight taps
    b_ref: (C_out, 1)               f32   folded BN bias
    o_ref: (C_out, H_out*W_out)     f32   lane-dense output tile (NCHW relabel)
    """
    x = x_ref[...]
    c_in = x.shape[-1]
    c_out = w_ref.shape[1]
    m = h_out * w_out
    h_span = (h_out - 1) * stride + 1
    w_span = (w_out - 1) * stride + 1

    # In-kernel im2col: kh*kw statically shifted views of the VMEM image, each
    # contracted against its (C_out, C_in) weight tap on the MXU, accumulated
    # in f32. No HBM patches array, no M padding.
    acc = jnp.zeros((c_out, m), jnp.float32)
    for i in range(kh):
        for j in range(kw):
            di = i * dilation
            dj = j * dilation
            tap = x[di:di + h_span:stride, dj:dj + w_span:stride, :]  # (h_out, w_out, C_in)
            tap = tap.reshape(m, c_in)                                # minor dim kept
            # (C_out, C_in) x (M, C_in)^T -> (C_out, M), rhs-transposed contraction.
            acc = acc + jax.lax.dot_general(
                w_ref[i * kw + j], tap,
                dimension_numbers=(((1,), (1,)), ((), ())),
                preferred_element_type=jnp.float32)

    y = acc + b_ref[...]          # folded BN bias (scale already in the weight)
    if relu:
        y = jnp.maximum(y, 0.0)
    o_ref[...] = y.astype(o_ref.dtype)   # (C_out, M): full 128-lane stores


@functools.partial(jax.jit,
                   static_argnames=("stride", "padding", "dilation", "relu", "bn"))
def basic_conv_forward(x_nchw, weight, gamma, beta, running_mean, running_var,
                       *, stride=1, padding=0, dilation=1, relu=True, bn=True,
                       eps=1e-5):
    """BasicConv forward. x_nchw: (N, C_in, H, W); weight: (C_out, C_in, KH, KW).

    Returns (N, C_out, H_out, W_out) in NCHW, matching the PyTorch module.
    """
    c_out, c_in, kh, kw = weight.shape
    n, _, h, w = x_nchw.shape
    h_out = (h + 2 * padding - dilation * (kh - 1) - 1) // stride + 1
    w_out = (w + 2 * padding - dilation * (kw - 1) - 1) // stride + 1
    h_pad = h + 2 * padding
    w_pad = w + 2 * padding
    m_img = h_out * w_out

    # Glue (single fused XLA pass): NCHW -> NHWC, spatial zero-pad, cast bf16.
    # TODO(synk): if the surrounding model provides NHWC activations, this
    # input-side transpose disappears entirely.
    x_nhwc = jnp.transpose(x_nchw, (0, 2, 3, 1))
    x_padded = jnp.pad(
        x_nhwc, ((0, 0), (padding, padding), (padding, padding), (0, 0)))
    x_padded = x_padded.astype(jnp.bfloat16)

    # Inference-mode BN folded into the conv: scale into the weight, bias kept.
    if bn:
        scale = gamma.astype(jnp.float32) / jnp.sqrt(
            running_var.astype(jnp.float32) + eps)
        bias = beta.astype(jnp.float32) - running_mean.astype(jnp.float32) * scale
    else:
        scale = jnp.ones((c_out,), jnp.float32)
        bias = jnp.zeros((c_out,), jnp.float32)
    # (C_out, C_in, KH, KW) -> (KH*KW, C_out, C_in) taps, scale folded, bf16.
    w_taps = jnp.transpose(weight.astype(jnp.float32), (2, 3, 0, 1))
    w_taps = (w_taps * scale[None, None, :, None]).reshape(kh * kw, c_out, c_in)
    w_taps = w_taps.astype(jnp.bfloat16)
    bias2d = bias.reshape(c_out, 1)

    kernel = functools.partial(
        _fused_conv_bn_relu_kernel, kh=kh, kw=kw, stride=stride,
        dilation=dilation, h_out=h_out, w_out=w_out, relu=relu)

    # TODO(synk): for production channel counts / image sizes, tile H (with a
    # kh-row halo) and C_out/K, and single-buffer the grid-invariant weight and
    # bias (pl.Buffered(1)) to stay inside v7x's 64 MiB VMEM.
    out = pl.pallas_call(
        kernel,
        out_shape=jax.ShapeDtypeStruct((n, c_out, m_img), jnp.float32),
        grid_spec=pltpu.PrefetchScalarGridSpec(
            num_scalar_prefetch=0,
            grid=(n,),
            in_specs=[
                pl.BlockSpec((None, h_pad, w_pad, c_in),
                             lambda b: (b, 0, 0, 0)),        # one padded image
                pl.BlockSpec((kh * kw, c_out, c_in),
                             lambda b: (0, 0, 0)),           # folded weight taps
                pl.BlockSpec((c_out, 1), lambda b: (0, 0)),  # folded BN bias
            ],
            out_specs=pl.BlockSpec((None, c_out, m_img), lambda b: (b, 0, 0)),
        ),
        compiler_params=pltpu.CompilerParams(
            dimension_semantics=("parallel",)),
    )(x_padded, w_taps, bias2d)

    # (N, C_out, H_out*W_out) -> NCHW is a pure relabel (no transpose).
    return out.reshape(n, c_out, h_out, w_out)


def _reference_f32(x, weight, gamma, beta, mean, var, *, stride, padding,
                   dilation, relu, bn, eps=1e-5):
    """Full-f32 PyTorch-semantics reference (Conv2d -> BN(eval) -> ReLU)."""
    y = jax.lax.conv_general_dilated(
        x.astype(jnp.float32), weight.astype(jnp.float32),
        window_strides=(stride, stride),
        padding=[(padding, padding), (padding, padding)],
        rhs_dilation=(dilation, dilation),
        dimension_numbers=("NCHW", "OIHW", "NCHW"))
    if bn:
        scale = gamma / jnp.sqrt(var + eps)
        y = (y * scale[None, :, None, None]
             + (beta - mean * scale)[None, :, None, None])
    if relu:
        y = jnp.maximum(y, 0.0)
    return y


def _reference_bf16_matched(x, weight, gamma, beta, mean, var, *, stride,
                            padding, dilation, relu, bn, eps=1e-5):
    """Same math as the kernel path: BN scale folded into the weight, then the
    activation and folded weight rounded to bf16, conv accumulated in f32."""
    c_out = weight.shape[0]
    if bn:
        scale = gamma / jnp.sqrt(var + eps)
        bias = beta - mean * scale
    else:
        scale = jnp.ones((c_out,), jnp.float32)
        bias = jnp.zeros((c_out,), jnp.float32)
    w_f = (weight * scale[:, None, None, None]
           ).astype(jnp.bfloat16).astype(jnp.float32)
    x_q = x.astype(jnp.bfloat16).astype(jnp.float32)
    y = jax.lax.conv_general_dilated(
        x_q, w_f, window_strides=(stride, stride),
        padding=[(padding, padding), (padding, padding)],
        rhs_dilation=(dilation, dilation),
        dimension_numbers=("NCHW", "OIHW", "NCHW"),
        precision=jax.lax.Precision.HIGHEST)
    y = y + bias[None, :, None, None]
    if relu:
        y = jnp.maximum(y, 0.0)
    return y


if __name__ == "__main__":
    # BasicConv(in_planes=4, out_planes=8, kernel_size=3, stride=1, padding=1)
    N, C_IN, H, W = 2, 4, 16, 16
    C_OUT, KH, KW = 8, 3, 3
    STRIDE, PADDING, DILATION = 1, 1, 1
    EPS = 1e-5

    key = jax.random.PRNGKey(0)
    kx, kw_, kg, kb, km, kv = jax.random.split(key, 6)
    x = jax.random.normal(kx, (N, C_IN, H, W), jnp.float32)
    weight = jax.random.normal(kw_, (C_OUT, C_IN, KH, KW), jnp.float32) * 0.1
    gamma = jax.random.normal(kg, (C_OUT,), jnp.float32) * 0.1 + 1.0
    beta = jax.random.normal(kb, (C_OUT,), jnp.float32) * 0.1
    running_mean = jax.random.normal(km, (C_OUT,), jnp.float32) * 0.1
    running_var = jax.random.uniform(kv, (C_OUT,), jnp.float32,
                                     minval=0.5, maxval=1.5)

    y = basic_conv_forward(x, weight, gamma, beta, running_mean, running_var,
                           stride=STRIDE, padding=PADDING, dilation=DILATION,
                           relu=True, bn=True)
    y = jax.block_until_ready(y)
    assert y.shape == (N, C_OUT, H, W), y.shape

    # Tight check: reference uses the same bf16-rounded activation / folded
    # weight -> validates im2col, BN fold, ReLU and the NCHW output relabel.
    y_tight = _reference_bf16_matched(
        x, weight, gamma, beta, running_mean, running_var,
        stride=STRIDE, padding=PADDING, dilation=DILATION, relu=True, bn=True,
        eps=EPS)
    err_tight = float(jnp.max(jnp.abs(y - y_tight)))
    assert err_tight < 1e-3, err_tight

    # Loose end-to-end check vs the full-f32 PyTorch-semantics reference
    # (bf16 MXU inputs are the only difference).
    y_f32 = _reference_f32(
        x, weight, gamma, beta, running_mean, running_var,
        stride=STRIDE, padding=PADDING, dilation=DILATION, relu=True, bn=True,
        eps=EPS)
    err_f32 = float(jnp.max(jnp.abs(y - y_f32)))
    assert err_f32 < 1e-1, err_f32

    print("KERNEL_OK")
</pallas_src>

<mosaic_0001>
module attributes {stable_mosaic.version = 11 : i64} {
  func.func @_fused_conv_bn_relu_kernel(%arg0: i32, %arg1: memref<1x18x18x4xbf16, #tpu.memory_space<vmem>>, %arg2: memref<9x8x4xbf16, #tpu.memory_space<vmem>>, %arg3: memref<8x1xf32, #tpu.memory_space<vmem>>, %arg4: memref<1x8x256xf32, #tpu.memory_space<vmem>>) attributes {dimension_semantics = [#tpu.dimension_semantics<parallel>], iteration_bounds = array<i64: 2>, scalar_prefetch = 0 : i64, scratch_operands = 0 : i64, tpu.core_type = #tpu.core_type<tc>, window_params = [{transform_indices = @transform_0, window_bounds = array<i64: 1, 18, 18, 4>}, {pipeline_mode = #tpu.pipeline_mode<synchronous>, transform_indices = @transform_1, window_bounds = array<i64: 9, 8, 4>}, {pipeline_mode = #tpu.pipeline_mode<synchronous>, transform_indices = @transform_2, window_bounds = array<i64: 8, 1>}, {transform_indices = @transform_3, window_bounds = array<i64: 1, 8, 256>}]} {
    %c0 = arith.constant 0 : index
    %c0_0 = arith.constant 0 : index
    %c0_1 = arith.constant 0 : index
    %c0_2 = arith.constant 0 : index
    %0 = vector.load %arg1[%c0, %c0_0, %c0_1, %c0_2] : memref<1x18x18x4xbf16, #tpu.memory_space<vmem>>, vector<1x18x18x4xbf16>
    %1 = vector.shape_cast %0 : vector<1x18x18x4xbf16> to vector<18x18x4xbf16>
    %cst = arith.constant 0.000000e+00 : f32
    %2 = vector.broadcast %cst : f32 to vector<8x256xf32>
    %3 = vector.extract_strided_slice %1 {offsets = [0, 0, 0], sizes = [16, 16, 4], strides = [1, 1, 1]} : vector<18x18x4xbf16> to vector<16x16x4xbf16>
    %4 = vector.shape_cast %3 : vector<16x16x4xbf16> to vector<256x4xbf16>
    %c0_3 = arith.constant 0 : index
    %c0_4 = arith.constant 0 : index
    %c0_5 = arith.constant 0 : index
    %5 = vector.load %arg2[%c0_3, %c0_4, %c0_5] : memref<9x8x4xbf16, #tpu.memory_space<vmem>>, vector<1x8x4xbf16>
    %6 = vector.shape_cast %5 : vector<1x8x4xbf16> to vector<8x4xbf16>
    %cst_6 = arith.constant dense<0.000000e+00> : vector<8x256xf32>
    %7 = tpu.matmul %6, %4, %cst_6 {dimension_numbers = #tpu.dot_dimension_numbers<[1], [1], [0], [0], [0, 0, 1, 0], [], []>} : vector<8x4xbf16>, vector<256x4xbf16>, vector<8x256xf32> -> vector<8x256xf32>
    %8 = arith.addf %2, %7 : vector<8x256xf32>
    %9 = vector.extract_strided_slice %1 {offsets = [0, 1, 0], sizes = [16, 16, 4], strides = [1, 1, 1]} : vector<18x18x4xbf16> to vector<16x16x4xbf16>
    %10 = vector.shape_cast %9 : vector<16x16x4xbf16> to vector<256x4xbf16>
    %c1 = arith.constant 1 : index
    %c0_7 = arith.constant 0 : index
    %c0_8 = arith.constant 0 : index
    %11 = vector.load %arg2[%c1, %c0_7, %c0_8] : memref<9x8x4xbf16, #tpu.memory_space<vmem>>, vector<1x8x4xbf16>
    %12 = vector.shape_cast %11 : vector<1x8x4xbf16> to vector<8x4xbf16>
    %cst_9 = arith.constant dense<0.000000e+00> : vector<8x256xf32>
    %13 = tpu.matmul %12, %10, %cst_9 {dimension_numbers = #tpu.dot_dimension_numbers<[1], [1], [0], [0], [0, 0, 1, 0], [], []>} : vector<8x4xbf16>, vector<256x4xbf16>, vector<8x256xf32> -> vector<8x256xf32>
    %14 = arith.addf %8, %13 : vector<8x256xf32>
    %15 = vector.extract_strided_slice %1 {offsets = [0, 2, 0], sizes = [16, 16, 4], strides = [1, 1, 1]} : vector<18x18x4xbf16> to vector<16x16x4xbf16>
    %16 = vector.shape_cast %15 : vector<16x16x4xbf16> to vector<256x4xbf16>
    %c2 = arith.constant 2 : index
    %c0_10 = arith.constant 0 : index
    %c0_11 = arith.constant 0 : index
    %17 = vector.load %arg2[%c2, %c0_10, %c0_11] : memref<9x8x4xbf16, #tpu.memory_space<vmem>>, vector<1x8x4xbf16>
    %18 = vector.shape_cast %17 : vector<1x8x4xbf16> to vector<8x4xbf16>
    %cst_12 = arith.constant dense<0.000000e+00> : vector<8x256xf32>
    %19 = tpu.matmul %18, %16, %cst_12 {dimension_numbers = #tpu.dot_dimension_numbers<[1], [1], [0], [0], [0, 0, 1, 0], [], []>} : vector<8x4xbf16>, vector<256x4xbf16>, vector<8x256xf32> -> vector<8x256xf32>
    %20 = arith.addf %14, %19 : vector<8x256xf32>
    %21 = vector.extract_strided_slice %1 {offsets = [1, 0, 0], sizes = [16, 16, 4], strides = [1, 1, 1]} : vector<18x18x4xbf16> to vector<16x16x4xbf16>
    %22 = vector.shape_cast %21 : vector<16x16x4xbf16> to vector<256x4xbf16>
    %c3 = arith.constant 3 : index
    %c0_13 = arith.constant 0 : index
    %c0_14 = arith.constant 0 : index
    %23 = vector.load %arg2[%c3, %c0_13, %c0_14] : memref<9x8x4xbf16, #tpu.memory_space<vmem>>, vector<1x8x4xbf16>
    %24 = vector.shape_cast %23 : vector<1x8x4xbf16> to vector<8x4xbf16>
    %cst_15 = arith.constant dense<0.000000e+00> : vector<8x256xf32>
    %25 = tpu.matmul %24, %22, %cst_15 {dimension_numbers = #tpu.dot_dimension_numbers<[1], [1], [0], [0], [0, 0, 1, 0], [], []>} : vector<8x4xbf16>, vector<256x4xbf16>, vector<8x256xf32> -> vector<8x256xf32>
    %26 = arith.addf %20, %25 : vector<8x256xf32>
    %27 = vector.extract_strided_slice %1 {offsets = [1, 1, 0], sizes = [16, 16, 4], strides = [1, 1, 1]} : vector<18x18x4xbf16> to vector<16x16x4xbf16>
    %28 = vector.shape_cast %27 : vector<16x16x4xbf16> to vector<256x4xbf16>
    %c4 = arith.constant 4 : index
    %c0_16 = arith.constant 0 : index
    %c0_17 = arith.constant 0 : index
    %29 = vector.load %arg2[%c4, %c0_16, %c0_17] : memref<9x8x4xbf16, #tpu.memory_space<vmem>>, vector<1x8x4xbf16>
    %30 = vector.shape_cast %29 : vector<1x8x4xbf16> to vector<8x4xbf16>
    %cst_18 = arith.constant dense<0.000000e+00> : vector<8x256xf32>
    %31 = tpu.matmul %30, %28, %cst_18 {dimension_numbers = #tpu.dot_dimension_numbers<[1], [1], [0], [0], [0, 0, 1, 0], [], []>} : vector<8x4xbf16>, vector<256x4xbf16>, vector<8x256xf32> -> vector<8x256xf32>
    %32 = arith.addf %26, %31 : vector<8x256xf32>
    %33 = vector.extract_strided_slice %1 {offsets = [1, 2, 0], sizes = [16, 16, 4], strides = [1, 1, 1]} : vector<18x18x4xbf16> to vector<16x16x4xbf16>
    %34 = vector.shape_cast %33 : vector<16x16x4xbf16> to vector<256x4xbf16>
    %c5 = arith.constant 5 : index
    %c0_19 = arith.constant 0 : index
    %c0_20 = arith.constant 0 : index
    %35 = vector.load %arg2[%c5, %c0_19, %c0_20] : memref<9x8x4xbf16, #tpu.memory_space<vmem>>, vector<1x8x4xbf16>
    %36 = vector.shape_cast %35 : vector<1x8x4xbf16> to vector<8x4xbf16>
    %cst_21 = arith.constant dense<0.000000e+00> : vector<8x256xf32>
    %37 = tpu.matmul %36, %34, %cst_21 {dimension_numbers = #tpu.dot_dimension_numbers<[1], [1], [0], [0], [0, 0, 1, 0], [], []>} : vector<8x4xbf16>, vector<256x4xbf16>, vector<8x256xf32> -> vector<8x256xf32>
    %38 = arith.addf %32, %37 : vector<8x256xf32>
    %39 = vector.extract_strided_slice %1 {offsets = [2, 0, 0], sizes = [16, 16, 4], strides = [1, 1, 1]} : vector<18x18x4xbf16> to vector<16x16x4xbf16>
    %40 = vector.shape_cast %39 : vector<16x16x4xbf16> to vector<256x4xbf16>
    %c6 = arith.constant 6 : index
    %c0_22 = arith.constant 0 : index
    %c0_23 = arith.constant 0 : index
    %41 = vector.load %arg2[%c6, %c0_22, %c0_23] : memref<9x8x4xbf16, #tpu.memory_space<vmem>>, vector<1x8x4xbf16>
    %42 = vector.shape_cast %41 : vector<1x8x4xbf16> to vector<8x4xbf16>
    %cst_24 = arith.constant dense<0.000000e+00> : vector<8x256xf32>
    %43 = tpu.matmul %42, %40, %cst_24 {dimension_numbers = #tpu.dot_dimension_numbers<[1], [1], [0], [0], [0, 0, 1, 0], [], []>} : vector<8x4xbf16>, vector<256x4xbf16>, vector<8x256xf32> -> vector<8x256xf32>
    %44 = arith.addf %38, %43 : vector<8x256xf32>
    %45 = vector.extract_strided_slice %1 {offsets = [2, 1, 0], sizes = [16, 16, 4], strides = [1, 1, 1]} : vector<18x18x4xbf16> to vector<16x16x4xbf16>
    %46 = vector.shape_cast %45 : vector<16x16x4xbf16> to vector<256x4xbf16>
    %c7 = arith.constant 7 : index
    %c0_25 = arith.constant 0 : index
    %c0_26 = arith.constant 0 : index
    %47 = vector.load %arg2[%c7, %c0_25, %c0_26] : memref<9x8x4xbf16, #tpu.memory_space<vmem>>, vector<1x8x4xbf16>
    %48 = vector.shape_cast %47 : vector<1x8x4xbf16> to vector<8x4xbf16>
    %cst_27 = arith.constant dense<0.000000e+00> : vector<8x256xf32>
    %49 = tpu.matmul %48, %46, %cst_27 {dimension_numbers = #tpu.dot_dimension_numbers<[1], [1], [0], [0], [0, 0, 1, 0], [], []>} : vector<8x4xbf16>, vector<256x4xbf16>, vector<8x256xf32> -> vector<8x256xf32>
    %50 = arith.addf %44, %49 : vector<8x256xf32>
    %51 = vector.extract_strided_slice %1 {offsets = [2, 2, 0], sizes = [16, 16, 4], strides = [1, 1, 1]} : vector<18x18x4xbf16> to vector<16x16x4xbf16>
    %52 = vector.shape_cast %51 : vector<16x16x4xbf16> to vector<256x4xbf16>
    %c8 = arith.constant 8 : index
    %c0_28 = arith.constant 0 : index
    %c0_29 = arith.constant 0 : index
    %53 = vector.load %arg2[%c8, %c0_28, %c0_29] : memref<9x8x4xbf16, #tpu.memory_space<vmem>>, vector<1x8x4xbf16>
    %54 = vector.shape_cast %53 : vector<1x8x4xbf16> to vector<8x4xbf16>
    %cst_30 = arith.constant dense<0.000000e+00> : vector<8x256xf32>
    %55 = tpu.matmul %54, %52, %cst_30 {dimension_numbers = #tpu.dot_dimension_numbers<[1], [1], [0], [0], [0, 0, 1, 0], [], []>} : vector<8x4xbf16>, vector<256x4xbf16>, vector<8x256xf32> -> vector<8x256xf32>
    %56 = arith.addf %50, %55 : vector<8x256xf32>
    %c0_31 = arith.constant 0 : index
    %c0_32 = arith.constant 0 : index
    %57 = vector.load %arg3[%c0_31, %c0_32] : memref<8x1xf32, #tpu.memory_space<vmem>>, vector<8x1xf32>
    %58 = vector.broadcast %57 : vector<8x1xf32> to vector<8x256xf32>
    %59 = arith.addf %56, %58 : vector<8x256xf32>
    %cst_33 = arith.constant 0.000000e+00 : f32
    %60 = vector.broadcast %cst_33 : f32 to vector<8x256xf32>
    %61 = arith.maximumf %59, %60 : vector<8x256xf32>
    %c0_34 = arith.constant 0 : index
    %c0_35 = arith.constant 0 : index
    %c0_36 = arith.constant 0 : index
    %62 = vector.load %arg4[%c0_34, %c0_35, %c0_36] : memref<1x8x256xf32, #tpu.memory_space<vmem>>, vector<1x8x256xf32>
    %63 = vector.shape_cast %62 : vector<1x8x256xf32> to vector<8x256xf32>
    %64 = vector.shape_cast %61 : vector<8x256xf32> to vector<1x8x256xf32>
    tpu.vector_store %arg4[%c0_34, %c0_35, %c0_36], %64 {strides = array<i32>} : memref<1x8x256xf32, #tpu.memory_space<vmem>>, vector<1x8x256xf32>,
    return
  }
  func.func @transform_0(%arg0: i32) -> (i32, i32, i32, i32) {
    %c0_i32 = arith.constant 0 : i32
    %c0_i32_0 = arith.constant 0 : i32
    %c0_i32_1 = arith.constant 0 : i32
    %c0_i32_2 = arith.constant 0 : i32
    return %arg0, %c0_i32, %c0_i32_0, %c0_i32_1 : i32, i32, i32, i32
  }
  func.func @transform_1(%arg0: i32) -> (i32, i32, i32) {
    %c0_i32 = arith.constant 0 : i32
    %c0_i32_0 = arith.constant 0 : i32
    %c0_i32_1 = arith.constant 0 : i32
    %c0_i32_2 = arith.constant 0 : i32
    return %c0_i32, %c0_i32_0, %c0_i32_1 : i32, i32, i32
  }
  func.func @transform_2(%arg0: i32) -> (i32, i32) {
    %c0_i32 = arith.constant 0 : i32
    %c0_i32_0 = arith.constant 0 : i32
    %c0_i32_1 = arith.constant 0 : i32
    return %c0_i32, %c0_i32_0 : i32, i32
  }
  func.func @transform_3(%arg0: i32) -> (i32, i32, i32) {
    %c0_i32 = arith.constant 0 : i32
    %c0_i32_0 = arith.constant 0 : i32
    %c0_i32_1 = arith.constant 0 : i32
    return %arg0, %c0_i32, %c0_i32_0 : i32, i32, i32
  }
}

</mosaic_0001>

<bundles_post_ra>
// kernel: basic_conv_forward.1
= control target key start
LH: loop header
LB: loop body
LE: loop exit
PB: predicated region body
PF: predicated region fallthrough
CT: control target
= control target key end

     0   :  { %s1712_s12 = smov 0   ;;  %s2533_s0 = inlined_call_operand.vmem [shape: bf16[2,18,18,4], index: 0, kind: input, shape index: {}]   ;;  %s2534_s1 = inlined_call_operand.vmem [shape: bf16[9,8,4], index: 1, kind: input, shape index: {}]   ;;  %s2535_s2 = inlined_call_operand.vmem [shape: f32[8,1], index: 2, kind: input, shape index: {}]   ;;  %s2536_s3 = inlined_call_operand.vmem [shape: f32[2,8,256], index: 3, kind: output, shape index: {}]  }
   0x1 LB: > { %s1527_s13 = sadd.s32 4294967295, %s1689_s12   ;;  %p1531_p0 = scmp.ge.s32.totalorder %s1689_s12, 1  ;;  %s1689_s12 = sphi %s1712_s12, %s13_s12  }
   0x2   : > { %p137_p1 = scmp.lt.s32.totalorder %s1689_s12, 3 }
   0x4   : > { %p138_p2 = pnand %p1531_p0, %p137_p1 }
   0x6   : > { %141 = sbr.rel (%p138_p2) target bundleno = 508 (0x1fc), region = 32 }
   0xb   : > { %p161_p3 = scmp.lt.s32.totalorder %s1527_s13, 1  ;;  %vm663_vm0 = vcmask 31744   ;;  %vm226_vm1 = vsmask.f32 3328  ;;  %vm227_vm2 = vsmask.f32 7440 }
   0xc   : > { %vm1769_vm3 = vmor %vm226_vm1, %vm227_vm2  ;;  %vm914_vm4 = vcmask 1042432   ;;  %vm915_vm5 = vcmask 1046532  }
   0xd   : > { %s2670_s13 = smov (!%p161_p3, %s1527_s13), 1  ;;  %vm2161_vm6 = vmor %vm914_vm4, %vm915_vm5 }
   0xe   : > { %s1672_s14 = smul.u32 216, %s2670_s13  ;;  %s1653_s11 = sshll.u32 %s2670_s13, 4 }
   0xf   : > { %s170_s16 = scalar_lea.vmem %s2536_s3, %s1653_s11 }
  0x10   : > { %s1726_s17 = scalar_lea.vmem %s2533_s0, %s1672_s14 }
  0x11   : > { %v1661_v0 = vld [vmem:[%s1726_s17 + $0x54] sm:$0xff]  ;;  %v1737_v4 = vld [vmem:[%s1726_s17 + $0x5c] sm:$0x1]  ;;  %v1660_v26 = vld [vmem:[%s1726_s17 + $0x48] sm:$0xff] }
  0x12   : > { %v1669_v1 = vld [vmem:[%s1726_s17 + $0xb4] sm:$0xff]  ;;  %v1742_v7 = vsel %vm663_vm0, %v1661_v0, 0  ;;  %v417_v14 = vshll.u32 %v1737_v4, 16  ;;  %v1760_v19 = vld [vmem:[%s1726_s17 + $0xbc] sm:$0x1]  ;;  %v1668_v27 = vld [vmem:[%s1726_s17 + $0xa8] sm:$0xff] }
  0x13   : > { %v1731_v2 = vld [vmem:[%s1726_s17 + $0x54] sm:$0xf]  ;;  %v1734_v3 = vld [vmem:[%s1726_s17 + $0x58] sm:$0xf]  ;;  %v1745_v8 = vsel %vm663_vm0, %v1669_v1, 0  ;;  %872 = vmatpush.bf16.xpose.msra.mxu2 %v1742_v7  ;;  %v609_v32 = vshll.u32 %v1760_v19, 16 }
  0x14   : > { %v398_v5 = vshrl.u32 %v1731_v2, 16  ;;  %v401_v6 = vshll.u32 %v1731_v2, 16  ;;  %v407_v9 = vshll.u32 %v1734_v3, 16  ;;  %v411_v10 = vshrl.u32 %v1734_v3, 16  ;;  %v1750_v11 = vld [vmem:[%s1726_s17 + $0xb4] sm:$0xf]  ;;  %885 = vmatpush.bf16.xpose.msra.mxu3 %v1745_v8 }
  0x15   : > { %v1756_v15 = vld [vmem:[%s1726_s17 + $0xb8] sm:$0xf]  ;;  %v590_v16 = vshrl.u32 %v1750_v11, 16  ;;  %v593_v20 = vshll.u32 %v1750_v11, 16  ;;  %v419_v23 = vrot.slane %v417_v14, 5  ;;  %v1778_v36 = vsel %vm663_vm0, %v1660_v26, 0 }
  0x16   : > { %v400_v12 = vrot.slane %v398_v5, 4  ;;  %v403_v13 = vrot.slane %v401_v6, 5  ;;  %v409_v17 = vrot.slane %v407_v9, 5  ;;  %v413_v18 = vrot.slane %v411_v10, 4  ;;  %v1775_v33 = vld [vmem:[%s1726_s17 + $0x48] sm:$0xf] }
  0x17   : > { %v599_v21 = vshll.u32 %v1756_v15, 16  ;;  %v592_v24 = vrot.slane %v590_v16, 4  ;;  %v603_v25 = vshrl.u32 %v1756_v15, 16  ;;  %v595_v30 = vrot.slane %v593_v20, 5  ;;  %v1784_v38 = vld [vmem:[%s1726_s17 + $0x4c] sm:$0xf] }
  0x18   : > { %v404_v22 = vor.u32 %v403_v13, %v400_v12  ;;  %v414_v29 = vor.u32 %v413_v18, %v409_v17  ;;  %v1781_v37 = vsel %vm663_vm0, %v1668_v27, 0  ;;  %v611_v41 = vrot.slane %v609_v32, 5  ;;  %v1790_v45 = vld [vmem:[%s1726_s17 + $0x50] sm:$0x1]  ;;  %v1795_v48 = vld [vmem:[%s1726_s17 + $0xa8] sm:$0xf] }
  0x19   : > { %v601_v31 = vrot.slane %v599_v21, 5  ;;  %v605_v35 = vrot.slane %v603_v25, 4  ;;  %v596_v40 = vor.u32 %v595_v30, %v592_v24  ;;  %v374_v42 = vshrl.u32 %v1775_v33, 16  ;;  %v1806_v60 = vld [vmem:[%s1726_s17 + $0xac] sm:$0xf]  ;;  %v1659_v6 = vld [vmem:[%s1726_s17 + $0x3c] sm:$0xff] }
  0x1a   : > { %v405_v34 = vrot.slane %v404_v22, 4  ;;  %v415_v39 = vrot.slane %v414_v29, 4  ;;  %v377_v46 = vshll.u32 %v1775_v33, 16  ;;  %v383_v47 = vshll.u32 %v1784_v38, 16  ;;  %v1812_v5 = vld [vmem:[%s1726_s17 + $0xb0] sm:$0x1] }
  0x1b   : > { %v606_v44 = vor.u32 %v605_v35, %v601_v31  ;;  %v597_v51 = vrot.slane %v596_v40, 4  ;;  %v376_v52 = vrot.slane %v374_v42, 4  ;;  %873 = vmatpush.bf16.xpose.msra.mxu2 %v1778_v36  ;;  %v387_v58 = vshrl.u32 %v1784_v38, 16  ;;  %v1667_v20 = vld [vmem:[%s1726_s17 + $0x9c] sm:$0xff] }
  0x1c   : > { %v410_v43 = vsel %vm1769_vm3, %v405_v34, %v409_v17  ;;  %v420_v49 = vsel %vm1769_vm3, %v415_v39, %v419_v23  ;;  %886 = vmatpush.bf16.xpose.msra.mxu3 %v1781_v37  ;;  %v379_v55 = vrot.slane %v377_v46, 5  ;;  %v385_v56 = vrot.slane %v383_v47, 5  ;;  %v1825_v25 = vld [vmem:[%s1726_s17 + $0x3c] sm:$0xf] }
  0x1d   : > { %v629_v50 = vunpack.c.l.b16 %v410_v43  ;;  %v630_v53 = vunpack.c.l.b16 %v420_v49  ;;  %v607_v54 = vrot.slane %v606_v44, 4  ;;  %v602_v57 = vsel %vm1769_vm3, %v597_v51, %v601_v31  ;;  %v1833_v31 = vld [vmem:[%s1726_s17 + $0x40] sm:$0xf]  ;;  %v1844_v43 = vld [vmem:[%s1726_s17 + $0x44] sm:$0x1] }
  0x1e   : > { %v393_v59 = vshll.u32 %v1790_v45, 16  ;;  %v566_v61 = vshrl.u32 %v1795_v48, 16  ;;  %v645_v0 = vunpack.c.l.b16 %v602_v57  ;;  %v380_v1 = vor.u32 %v379_v55, %v376_v52  ;;  %v1853_v51 = vld [vmem:[%s1726_s17 + $0x9c] sm:$0xf] }
  0x1f   : > { %v654_v62 = vpack.c.b16 %v630_v53, %v629_v50  ;;  %v612_v63 = vsel %vm1769_vm3, %v607_v54, %v611_v41  ;;  %v389_v10 = vrot.slane %v387_v58, 4  ;;  %v569_v17 = vshll.u32 %v1795_v48, 16 }
  0x20   : > { %v646_v9 = vunpack.c.l.b16 %v612_v63  ;;  %v395_v12 = vrot.slane %v393_v59, 5  ;;  %v568_v13 = vrot.slane %v566_v61, 4  ;;  %v381_v16 = vrot.slane %v380_v1, 4 }
  0x21   : > { %v1816_v14 = vsel %vm663_vm0, %v654_v62, 0  ;;  %v575_v18 = vshll.u32 %v1806_v60, 16  ;;  %v390_v22 = vor.u32 %v389_v10, %v385_v56  ;;  %v579_v23 = vshrl.u32 %v1806_v60, 16 }
  0x22   : > { %2593 = vst [vmem:[#allocation2_spill] sm:$0xff] %v1816_v14  ;;  %715 = vmatpush.bf16.xpose.msra.mxu0 %v1816_v14  ;;  %v662_v21 = vpack.c.b16 %v646_v9, %v645_v0  ;;  %v585_v24 = vshll.u32 %v1812_v5, 16  ;;  %v386_v26 = vsel %vm1769_vm3, %v381_v16, %v385_v56  ;;  %v571_v27 = vrot.slane %v569_v17, 5  ;;  %v1860_v0 = vld [vmem:[%s1726_s17 + $0xa0] sm:$0xf] }
  0x23   : > { %v577_v29 = vrot.slane %v575_v18, 5  ;;  %v1830_v30 = vsel %vm663_vm0, %v1659_v6, 0  ;;  %v391_v34 = vrot.slane %v390_v22, 4  ;;  %v627_v35 = vunpack.c.l.b16 %v386_v26  ;;  %v1658_v6 = vld [vmem:[%s1726_s17 + $0x30] sm:$0xff]  ;;  %v1867_v16 = vld [vmem:[%s1726_s17 + $0xa4] sm:$0x1] }
  0x24   : > { %v1836_v32 = vsel %vm663_vm0, %v662_v21, 0  ;;  %v581_v39 = vrot.slane %v579_v23, 4  ;;  %v572_v40 = vor.u32 %v571_v27, %v568_v13  ;;  %v587_v41 = vrot.slane %v585_v24, 5  ;;  %874 = vmatpush.bf16.xpose.msra.mxu2 %v1830_v30  ;;  %v1666_v27 = vld [vmem:[%s1726_s17 + $0x90] sm:$0xff]  ;;  %v2002_v14 = vld [vmem:[%s1726_s17 + $0x20] sm:$0x1] }
  0x25   : > { %2594 = vst [vmem:[#allocation3_spill] sm:$0xff] %v1836_v32  ;;  %728 = vmatpush.bf16.xpose.msra.mxu1 %v1836_v32  ;;  %v1841_v42 = vsel %vm663_vm0, %v1667_v20, 0  ;;  %v350_v44 = vshrl.u32 %v1825_v25, 16  ;;  %v396_v46 = vsel %vm1769_vm3, %v391_v34, %v395_v12  ;;  %v353_v49 = vshll.u32 %v1825_v25, 16 }
  0x26   : > { %v582_v47 = vor.u32 %v581_v39, %v577_v29  ;;  %887 = vmatpush.bf16.xpose.msra.mxu3 %v1841_v42  ;;  %v359_v50 = vshll.u32 %v1833_v31, 16  ;;  %v628_v52 = vunpack.c.l.b16 %v396_v46  ;;  %v573_v53 = vrot.slane %v572_v40, 4  ;;  %v1882_v40 = vld [vmem:[%s1726_s17 + $0x30] sm:$0xf]  ;;  %2606 = vst [vmem:[#allocation15_spill] sm:$0xff] %v2002_v14 }
  0x27   : > { %v352_v54 = vrot.slane %v350_v44, 4  ;;  %v363_v55 = vshrl.u32 %v1833_v31, 16  ;;  %v355_v57 = vrot.slane %v353_v49, 5  ;;  %v369_v59 = vshll.u32 %v1844_v43, 16  ;;  %v1888_v49 = vld [vmem:[%s1726_s17 + $0x34] sm:$0xf] }
  0x28   : > { %v583_v56 = vrot.slane %v582_v47, 4  ;;  %v361_v58 = vrot.slane %v359_v50, 5  ;;  %v653_v61 = vpack.c.b16 %v628_v52, %v627_v35  ;;  %v578_v62 = vsel %vm1769_vm3, %v573_v53, %v577_v29 }
  0x29   : > { %v365_v63 = vrot.slane %v363_v55, 4  ;;  %v542_v1 = vshrl.u32 %v1853_v51, 16  ;;  %v643_v10 = vunpack.c.l.b16 %v578_v62  ;;  %v356_v12 = vor.u32 %v355_v57, %v352_v54  ;;  %v1896_v55 = vld [vmem:[%s1726_s17 + $0x38] sm:$0x1] }
  0x2a   : > { %v588_v9 = vsel %vm1769_vm3, %v583_v56, %v587_v41  ;;  %v371_v13 = vrot.slane %v369_v59, 5  ;;  %v1870_v17 = vsel %vm663_vm0, %v653_v61, 0  ;;  %v545_v23 = vshll.u32 %v1853_v51, 16 }
  0x2b   : > { %2595 = vst [vmem:[#allocation4_spill] sm:$0xff] %v1870_v17  ;;  %v644_v18 = vunpack.c.l.b16 %v588_v9  ;;  %v366_v20 = vor.u32 %v365_v63, %v361_v58  ;;  %v544_v21 = vrot.slane %v542_v1, 4  ;;  %716 = vmatpush.bf16.xpose.msra.mxu0 %v1870_v17  ;;  %v357_v22 = vrot.slane %v356_v12, 4 }
  0x2c   : > { %v551_v24 = vshll.u32 %v1860_v0, 16  ;;  %v555_v26 = vshrl.u32 %v1860_v0, 16  ;;  %v561_v35 = vshll.u32 %v1867_v16, 16  ;;  %v1879_v39 = vsel %vm663_vm0, %v1658_v6, 0 }
  0x2d   : > { %v661_v29 = vpack.c.b16 %v644_v18, %v643_v10  ;;  %v367_v34 = vrot.slane %v366_v20, 4  ;;  %v362_v41 = vsel %vm1769_vm3, %v357_v22, %v361_v58  ;;  %v547_v44 = vrot.slane %v545_v23, 5  ;;  %875 = vmatpush.bf16.xpose.msra.mxu2 %v1879_v39  ;;  %v1912_v23 = vld [vmem:[%s1726_s17 + $0x94] sm:$0xf] }
  0x2e   : > { %v553_v46 = vrot.slane %v551_v24, 5  ;;  %v557_v47 = vrot.slane %v555_v26, 4  ;;  %v625_v53 = vunpack.c.l.b16 %v362_v41  ;;  %v563_v54 = vrot.slane %v561_v35, 5 }
  0x2f   : > { %v1891_v50 = vsel %vm663_vm0, %v661_v29, 0  ;;  %v372_v52 = vsel %vm1769_vm3, %v367_v34, %v371_v13  ;;  %v548_v57 = vor.u32 %v547_v44, %v544_v21  ;;  %v1900_v59 = vsel %vm663_vm0, %v1666_v27, 0  ;;  %v1909_v13 = vld [vmem:[%s1726_s17 + $0x90] sm:$0xf]  ;;  %v1922_v34 = vld [vmem:[%s1726_s17 + $0x98] sm:$0x1] }
  0x30   : > { %2596 = vst [vmem:[#allocation5_spill] sm:$0xff] %v1891_v50  ;;  %729 = vmatpush.bf16.xpose.msra.mxu1 %v1891_v50  ;;  %v626_v56 = vunpack.c.l.b16 %v372_v52  ;;  %v558_v58 = vor.u32 %v557_v47, %v553_v46  ;;  %888 = vmatpush.bf16.xpose.msra.mxu3 %v1900_v59  ;;  %v326_v61 = vshrl.u32 %v1882_v40, 16  ;;  %v329_v62 = vshll.u32 %v1882_v40, 16 }
  0x31   : > { %v335_v63 = vshll.u32 %v1888_v49, 16  ;;  %v339_v1 = vshrl.u32 %v1888_v49, 16  ;;  %v549_v9 = vrot.slane %v548_v57, 4  ;;  %v345_v12 = vshll.u32 %v1896_v55, 16 }
  0x32   : > { %v652_v6 = vpack.c.b16 %v626_v56, %v625_v53  ;;  %v559_v10 = vrot.slane %v558_v58, 4  ;;  %v328_v18 = vrot.slane %v326_v61, 4  ;;  %v331_v20 = vrot.slane %v329_v62, 5  ;;  %v1657_v62 = vld [vmem:[%s1726_s17 + $0x24] sm:$0xff] }
  0x33   : > { %v337_v21 = vrot.slane %v335_v63, 5  ;;  %v341_v22 = vrot.slane %v339_v1, 4  ;;  %v554_v26 = vsel %vm1769_vm3, %v549_v9, %v553_v46  ;;  %v347_v29 = vrot.slane %v345_v12, 5  ;;  %v1665_v63 = vld [vmem:[%s1726_s17 + $0x84] sm:$0xff] }
  0x34   : > { %v1915_v24 = vsel %vm663_vm0, %v652_v6, 0  ;;  %v564_v27 = vsel %vm1769_vm3, %v559_v10, %v563_v54  ;;  %v641_v35 = vunpack.c.l.b16 %v554_v26  ;;  %v332_v44 = vor.u32 %v331_v20, %v328_v18  ;;  %v1933_v12 = vld [vmem:[%s1726_s17 + $0x24] sm:$0xf] }
  0x35   : > { %2597 = vst [vmem:[#allocation6_spill] sm:$0xff] %v1915_v24  ;;  %717 = vmatpush.bf16.xpose.msra.mxu0 %v1915_v24  ;;  %v642_v41 = vunpack.c.l.b16 %v564_v27  ;;  %v342_v47 = vor.u32 %v341_v22, %v337_v21  ;;  %v518_v52 = vshrl.u32 %v1909_v13, 16  ;;  %v521_v53 = vshll.u32 %v1909_v13, 16  ;;  %v1943_v27 = vld [vmem:[%s1726_s17 + $0x28] sm:$0xf] }
  0x36   : > { %v527_v46 = vshll.u32 %v1912_v23, 16  ;;  %v531_v54 = vshrl.u32 %v1912_v23, 16  ;;  %v333_v57 = vrot.slane %v332_v44, 4  ;;  %v537_v61 = vshll.u32 %v1922_v34, 16 }
  0x37   : > { %v660_v56 = vpack.c.b16 %v642_v41, %v641_v35  ;;  %v343_v58 = vrot.slane %v342_v47, 4  ;;  %v520_v1 = vrot.slane %v518_v52, 4  ;;  %v523_v6 = vrot.slane %v521_v53, 5  ;;  %v1947_v52 = vld [vmem:[%s1726_s17 + $0x2c] sm:$0x1] }
  0x38   : > { %v529_v9 = vrot.slane %v527_v46, 5  ;;  %v533_v10 = vrot.slane %v531_v54, 4  ;;  %v338_v20 = vsel %vm1769_vm3, %v333_v57, %v337_v21  ;;  %v539_v26 = vrot.slane %v537_v61, 5  ;;  %v1961_v61 = vld [vmem:[%s1726_s17 + $0x84] sm:$0xf] }
  0x39   : > { %v1936_v18 = vsel %vm663_vm0, %v660_v56, 0  ;;  %v348_v22 = vsel %vm1769_vm3, %v343_v58, %v347_v29  ;;  %v623_v35 = vunpack.c.l.b16 %v338_v20  ;;  %v524_v44 = vor.u32 %v523_v6, %v520_v1 }
  0x3a   : > { %2598 = vst [vmem:[#allocation7_spill] sm:$0xff] %v1936_v18  ;;  %730 = vmatpush.bf16.xpose.msra.mxu1 %v1936_v18  ;;  %v624_v41 = vunpack.c.l.b16 %v348_v22  ;;  %v534_v47 = vor.u32 %v533_v10, %v529_v9  ;;  %v1950_v53 = vsel %vm663_vm0, %v1657_v62, 0  ;;  %v1953_v21 = vsel %vm663_vm0, %v1665_v63, 0  ;;  %v1966_v10 = vld [vmem:[%s1726_s17 + $0x88] sm:$0xf] }
  0x3b   : > { %2599 = vst [vmem:[#allocation8_spill] sm:$0xff] %v1950_v53  ;;  %v302_v29 = vshrl.u32 %v1933_v12, 16  ;;  %v305_v46 = vshll.u32 %v1933_v12, 16  ;;  %v525_v56 = vrot.slane %v524_v44, 4  ;;  %876 = vmatpush.bf16.xpose.msra.mxu2 %v1950_v53  ;;  %889 = vmatpush.bf16.xpose.msra.mxu3 %v1953_v21  ;;  %v311_v58 = vshll.u32 %v1943_v27, 16 }
  0x3c   : > { %2600 = vst [vmem:[#allocation9_spill] sm:$0xff] %v1953_v21  ;;  %v651_v54 = vpack.c.b16 %v624_v41, %v623_v35  ;;  %v535_v57 = vrot.slane %v534_v47, 4  ;;  %v315_v63 = vshrl.u32 %v1943_v27, 16  ;;  %v321_v6 = vshll.u32 %v1947_v52, 16  ;;  %v1977_v18 = vld [vmem:[%s1726_s17 + $0x8c] sm:$0x1] }
  0x3d   : > { %v304_v62 = vrot.slane %v302_v29, 4  ;;  %v307_v1 = vrot.slane %v305_v46, 5  ;;  %v530_v22 = vsel %vm1769_vm3, %v525_v56, %v529_v9  ;;  %v313_v41 = vrot.slane %v311_v58, 5  ;;  %v2027_v53 = vld [vmem:[%s1726_s17 + $0x80] sm:$0x1] }
  0x3e   : > { %v1969_v20 = vsel %vm663_vm0, %v651_v54, 0  ;;  %v540_v35 = vsel %vm1769_vm3, %v535_v57, %v539_v26  ;;  %v639_v44 = vunpack.c.l.b16 %v530_v22  ;;  %v317_v46 = vrot.slane %v315_v63, 4  ;;  %v1656_v26 = vld [vmem:[%s1726_s17 + $0x18] sm:$0xff]  ;;  %2610 = vst [vmem:[#allocation19_spill] sm:$0xff] %v2027_v53 }
  0x3f   : > { %2601 = vst [vmem:[#allocation10_spill] sm:$0xff] %v1969_v20  ;;  %718 = vmatpush.bf16.xpose.msra.mxu0 %v1969_v20  ;;  %v640_v47 = vunpack.c.l.b16 %v540_v35  ;;  %v308_v29 = vor.u32 %v307_v1, %v304_v62  ;;  %v323_v24 = vrot.slane %v321_v6, 5  ;;  %v494_v54 = vshrl.u32 %v1961_v61, 16  ;;  %v1664_v35 = vld [vmem:[%s1726_s17 + $0x78] sm:$0xff] }
  0x40   : > { %v497_v50 = vshll.u32 %v1961_v61, 16  ;;  %v503_v9 = vshll.u32 %v1966_v10, 16  ;;  %v318_v58 = vor.u32 %v317_v46, %v313_v41  ;;  %v507_v22 = vshrl.u32 %v1966_v10, 16  ;;  %v1987_v20 = vld [vmem:[%s1726_s17 + $0x18] sm:$0xf] }
  0x41   : > { %v659_v56 = vpack.c.b16 %v640_v47, %v639_v44  ;;  %v309_v57 = vrot.slane %v308_v29, 4  ;;  %v496_v62 = vrot.slane %v494_v54, 4  ;;  %v513_v6 = vshll.u32 %v1977_v18, 16  ;;  %2602 = vst [vmem:[#allocation11_spill] sm:$0xff] %v1987_v20  ;;  %v1995_v29 = vld [vmem:[%s1726_s17 + $0x1c] sm:$0xf] }
  0x42   : > { %v499_v1 = vrot.slane %v497_v50, 5  ;;  %v505_v63 = vrot.slane %v503_v9, 5  ;;  %v319_v44 = vrot.slane %v318_v58, 4  ;;  %v509_v47 = vrot.slane %v507_v22, 4  ;;  %2604 = vst [vmem:[#allocation13_spill] sm:$0xff] %v1995_v29 }
  0x43   : > { %v1990_v17 = vsel %vm663_vm0, %v659_v56, 0  ;;  %v314_v32 = vsel %vm1769_vm3, %v309_v57, %v313_v41  ;;  %v515_v50 = vrot.slane %v513_v6, 5  ;;  %v1999_v9 = vsel %vm663_vm0, %v1656_v26, 0 }
  0x44   : > { %2603 = vst [vmem:[#allocation12_spill] sm:$0xff] %v1990_v17  ;;  %731 = vmatpush.bf16.xpose.msra.mxu1 %v1990_v17  ;;  %v621_v46 = vunpack.c.l.b16 %v314_v32  ;;  %v500_v54 = vor.u32 %v499_v1, %v496_v62  ;;  %v324_v56 = vsel %vm1769_vm3, %v319_v44, %v323_v24  ;;  %v510_v21 = vor.u32 %v509_v47, %v505_v63  ;;  %v2022_v17 = vld [vmem:[%s1726_s17 + $0x7c] sm:$0xf] }
  0x45   : > { %2605 = vst [vmem:[#allocation14_spill] sm:$0xff] %v1999_v9  ;;  %877 = vmatpush.bf16.xpose.msra.mxu2 %v1999_v9  ;;  %v2008_v41 = vsel %vm663_vm0, %v1664_v35, 0  ;;  %v278_v32 = vshrl.u32 %v1987_v20, 16  ;;  %v622_v57 = vunpack.c.l.b16 %v324_v56  ;;  %v281_v26 = vshll.u32 %v1987_v20, 16  ;;  %v2017_v35 = vld [vmem:[%s1726_s17 + $0x78] sm:$0xf] }
  0x46   : > { %2607 = vst [vmem:[#allocation16_spill] sm:$0xff] %v2008_v41  ;;  %v501_v58 = vrot.slane %v500_v54, 4  ;;  %890 = vmatpush.bf16.xpose.msra.mxu3 %v2008_v41  ;;  %v287_v22 = vshll.u32 %v1995_v29, 16  ;;  %v511_v62 = vrot.slane %v510_v21, 4  ;;  %v291_v1 = vshrl.u32 %v1995_v29, 16 }
  0x47   : > { %v280_v24 = vrot.slane %v278_v32, 4  ;;  %v297_v6 = vshll.u32 %v2002_v14, 16  ;;  %2608 = vst [vmem:[#allocation17_spill] sm:$0xff] %v2017_v35  ;;  %v650_v44 = vpack.c.b16 %v622_v57, %v621_v46  ;;  %v283_v54 = vrot.slane %v281_v26, 5 }
  0x48   : > { %v506_v47 = vsel %vm1769_vm3, %v501_v58, %v505_v63  ;;  %v289_v56 = vrot.slane %v287_v22, 5  ;;  %2609 = vst [vmem:[#allocation18_spill] sm:$0xff] %v2022_v17  ;;  %v516_v41 = vsel %vm1769_vm3, %v511_v62, %v515_v50  ;;  %v293_v32 = vrot.slane %v291_v1, 4  ;;  %v1655_v58 = vld [vmem:[%s1726_s17 + $0xc] sm:$0xff] }
  0x49   : > { %v637_v21 = vunpack.c.l.b16 %v506_v47  ;;  %v299_v9 = vrot.slane %v297_v6, 5  ;;  %v2030_v14 = vsel %vm663_vm0, %v650_v44, 0  ;;  %v638_v46 = vunpack.c.l.b16 %v516_v41 }
  0x4a   : > { %2611 = vst [vmem:[#allocation20_spill] sm:$0xff] %v2030_v14  ;;  %v284_v57 = vor.u32 %v283_v54, %v280_v24  ;;  %v470_v63 = vshrl.u32 %v2017_v35, 16  ;;  %719 = vmatpush.bf16.xpose.msra.mxu0 %v2030_v14  ;;  %v294_v26 = vor.u32 %v293_v32, %v289_v56  ;;  %v473_v50 = vshll.u32 %v2017_v35, 16  ;;  %v1663_v24 = vld [vmem:[%s1726_s17 + $0x6c] sm:$0xff] }
  0x4b   : > { %v479_v22 = vshll.u32 %v2022_v17, 16  ;;  %v483_v62 = vshrl.u32 %v2022_v17, 16  ;;  %v658_v1 = vpack.c.b16 %v638_v46, %v637_v21  ;;  %v489_v41 = vshll.u32 %v2027_v53, 16  ;;  %v2041_v14 = vld [vmem:[%s1726_s17 + $0xc] sm:$0xf] }
  0x4c   : > { %v285_v6 = vrot.slane %v284_v57, 4  ;;  %v472_v44 = vrot.slane %v470_v63, 4  ;;  %v295_v47 = vrot.slane %v294_v26, 4  ;;  %v475_v54 = vrot.slane %v473_v50, 5  ;;  %2612 = vst [vmem:[#allocation21_spill] sm:$0xff] %v2041_v14 }
  0x4d   : > { %v481_v29 = vrot.slane %v479_v22, 5  ;;  %v485_v20 = vrot.slane %v483_v62, 4  ;;  %v2044_v32 = vsel %vm663_vm0, %v658_v1, 0  ;;  %v491_v17 = vrot.slane %v489_v41, 5  ;;  %v2052_v46 = vld [vmem:[%s1726_s17 + $0x10] sm:$0xf] }
  0x4e   : > { %2613 = vst [vmem:[#allocation22_spill] sm:$0xff] %v2044_v32  ;;  %v290_v35 = vsel %vm1769_vm3, %v285_v6, %v289_v56  ;;  %v2049_v21 = vsel %vm663_vm0, %v1655_v58, 0  ;;  %732 = vmatpush.bf16.xpose.msra.mxu1 %v2044_v32  ;;  %v300_v57 = vsel %vm1769_vm3, %v295_v47, %v299_v9  ;;  %v476_v26 = vor.u32 %v475_v54, %v472_v44  ;;  %v2059_v22 = vld [vmem:[%s1726_s17 + $0x14] sm:$0x1]  ;;  %v2071_v54 = vld [vmem:[%s1726_s17 + $0x6c] sm:$0xf] }
  0x4f   : > { %2614 = vst [vmem:[#allocation23_spill] sm:$0xff] %v2049_v21  ;;  %v619_v63 = vunpack.c.l.b16 %v290_v35  ;;  %v486_v50 = vor.u32 %v485_v20, %v481_v29  ;;  %878 = vmatpush.bf16.xpose.msra.mxu2 %v2049_v21  ;;  %v620_v56 = vunpack.c.l.b16 %v300_v57  ;;  %v2062_v62 = vsel %vm663_vm0, %v1663_v24, 0  ;;  %v2084_v21 = vld [vmem:[%s1726_s17 + $0x74] sm:$0x1] }
  0x50   : > { %2615 = vst [vmem:[#allocation24_spill] sm:$0xff] %v2052_v46  ;;  %v254_v58 = vshrl.u32 %v2041_v14, 16  ;;  %v257_v1 = vshll.u32 %v2041_v14, 16  ;;  %v477_v6 = vrot.slane %v476_v26, 4  ;;  %891 = vmatpush.bf16.xpose.msra.mxu3 %v2062_v62  ;;  %v263_v20 = vshll.u32 %v2052_v46, 16 }
  0x51   : > { %2616 = vst [vmem:[#allocation25_spill] sm:$0xff] %v2059_v22  ;;  %v487_v41 = vrot.slane %v486_v50, 4  ;;  %v267_v9 = vshrl.u32 %v2052_v46, 16  ;;  %v649_v35 = vpack.c.b16 %v620_v56, %v619_v63  ;;  %v273_v24 = vshll.u32 %v2059_v22, 16  ;;  %v2662_v28 = vld [vmem:[#allocation20_spill] sm:$0xff] }
  0x52   : > { %2617 = vst [vmem:[#allocation26_spill] sm:$0xff] %v2062_v62  ;;  %v256_v44 = vrot.slane %v254_v58, 4  ;;  %v259_v47 = vrot.slane %v257_v1, 5  ;;  %v482_v57 = vsel %vm1769_vm3, %v477_v6, %v481_v29  ;;  %v265_v50 = vrot.slane %v263_v20, 5  ;;  %v2078_v62 = vld [vmem:[%s1726_s17 + $0x70] sm:$0xf] }
  0x53   : > { %2618 = vst [vmem:[#allocation27_spill] sm:$0xff] %v2071_v54  ;;  %v492_v26 = vsel %vm1769_vm3, %v487_v41, %v491_v17  ;;  %v269_v32 = vrot.slane %v267_v9, 4  ;;  %v2081_v63 = vsel %vm663_vm0, %v649_v35, 0  ;;  %v635_v56 = vunpack.c.l.b16 %v482_v57 }
  0x54   : > { %2619 = vst [vmem:[#allocation28_spill] sm:$0xff] %v2078_v62  ;;  %v636_v58 = vunpack.c.l.b16 %v492_v26  ;;  %v260_v1 = vor.u32 %v259_v47, %v256_v44  ;;  %720 = vmatpush.bf16.xpose.msra.mxu0 %v2081_v63  ;;  %v275_v6 = vrot.slane %v273_v24, 5  ;;  %v446_v17 = vshrl.u32 %v2071_v54, 16  ;;  %v1654_v26 = vld [vmem:[%s1726_s17] sm:$0xff] }
  0x55   : > { %2620 = vst [vmem:[#allocation29_spill] sm:$0xff] %v2081_v63  ;;  %v270_v29 = vor.u32 %v269_v32, %v265_v50  ;;  %v449_v41 = vshll.u32 %v2071_v54, 16  ;;  %v455_v35 = vshll.u32 %v2078_v62, 16  ;;  %v459_v57 = vshrl.u32 %v2078_v62, 16  ;;  %v1662_v44 = vld [vmem:[%s1726_s17 + $0x60] sm:$0xff] }
  0x56   : > { %2621 = vst [vmem:[#allocation30_spill] sm:$0xff] %v2084_v21  ;;  %v657_v20 = vpack.c.b16 %v636_v58, %v635_v56  ;;  %v261_v9 = vrot.slane %v260_v1, 4  ;;  %v448_v22 = vrot.slane %v446_v17, 4  ;;  %v465_v32 = vshll.u32 %v2084_v21, 16  ;;  %v1670_v24 = vld [vmem:[%s1726_s17 + $0xc0] sm:$0xff] }
  0x57   : > { %v271_v47 = vrot.slane %v270_v29, 4  ;;  %v451_v46 = vrot.slane %v449_v41, 5  ;;  %v457_v58 = vrot.slane %v455_v35, 5  ;;  %v461_v1 = vrot.slane %v459_v57, 4  ;;  %v2101_v54 = vld [vmem:[%s1726_s17] sm:$0xf] }
  0x58   : > { %v2096_v63 = vsel %vm663_vm0, %v657_v20, 0  ;;  %v266_v56 = vsel %vm1769_vm3, %v261_v9, %v265_v50  ;;  %2623 = vst [vmem:[#allocation32_spill] sm:$0xff] %v2101_v54  ;;  %v467_v21 = vrot.slane %v465_v32, 5  ;;  %v2107_v62 = vld [vmem:[%s1726_s17 + $0x4] sm:$0xf]  ;;  %v825_v53 = vsel %vm663_vm0, %v1654_v26, 0 }
  0x59   : > { %2622 = vst [vmem:[#allocation31_spill] sm:$0xff] %v2096_v63  ;;  %733 = vmatpush.bf16.xpose.msra.mxu1 %v2096_v63  ;;  %v276_v29 = vsel %vm1769_vm3, %v271_v47, %v275_v6  ;;  %v617_v17 = vunpack.c.l.b16 %v266_v56  ;;  %v452_v41 = vor.u32 %v451_v46, %v448_v22  ;;  %v462_v20 = vor.u32 %v461_v1, %v457_v58  ;;  %v2114_v9 = vld [vmem:[%s1726_s17 + $0x8] sm:$0x1]  ;;  %v2127_v47 = vld [vmem:[%s1726_s17 + $0x60] sm:$0xf] }
  0x5a   : > { %2624 = vst [vmem:[#allocation33_spill] sm:$0xff] %v2107_v62  ;;  %v618_v14 = vunpack.c.l.b16 %v276_v29  ;;  %v2111_v50 = vsel %vm663_vm0, %v1662_v44, 0  ;;  %879 = vmatpush.bf16.xpose.msra.mxu2 %v825_v53  ;;  %v2118_v46 = vsel %vm663_vm0, %v1670_v24, 0  ;;  %v230_v22 = vshrl.u32 %v2101_v54, 16 }
  0x5b   : > { %2625 = vst [vmem:[#allocation34_spill] sm:$0xff] %v2111_v50  ;;  %v453_v35 = vrot.slane %v452_v41, 4  ;;  %892 = vmatpush.bf16.xpose.msra.mxu3 %v2111_v50  ;;  %v233_v6 = vshll.u32 %v2101_v54, 16  ;;  %v463_v26 = vrot.slane %v462_v20, 4  ;;  %v239_v44 = vshll.u32 %v2107_v62, 16 }
  0x5c   : > { %2626 = vst [vmem:[#allocation35_spill] sm:$0xff] %v2114_v9  ;;  %v648_v57 = vpack.c.b16 %v618_v14, %v617_v17  ;;  %v243_v53 = vshrl.u32 %v2107_v62, 16  ;;  %v232_v24 = vrot.slane %v230_v22, 4  ;;  %v249_v1 = vshll.u32 %v2114_v9, 16  ;;  %v2133_v14 = vld [vmem:[%s1726_s17 + $0x64] sm:$0xf] }
  0x5d   : > { %2627 = vst [vmem:[#allocation36_spill] sm:$0xff] %v2118_v46  ;;  %v458_v32 = vsel %vm1769_vm3, %v453_v35, %v457_v58  ;;  %v235_v56 = vrot.slane %v233_v6, 5  ;;  %v468_v17 = vsel %vm1769_vm3, %v463_v26, %v467_v21  ;;  %v241_v20 = vrot.slane %v239_v44, 5 }
  0x5e   : > { %2628 = vst [vmem:[#allocation37_spill] sm:$0xff] %v2133_v14  ;;  %v2136_v29 = vsel %vm663_vm0, %v648_v57, 0  ;;  %v633_v41 = vunpack.c.l.b16 %v458_v32  ;;  %v245_v35 = vrot.slane %v243_v53, 4  ;;  %v251_v22 = vrot.slane %v249_v1, 5 }
  0x5f   : > { %2629 = vst [vmem:[#allocation38_spill] sm:$0xff] %v2136_v29  ;;  %721 = vmatpush.bf16.xpose.msra.mxu0 %v2136_v29  ;;  %v236_v58 = vor.u32 %v235_v56, %v232_v24  ;;  %v422_v6 = vshrl.u32 %v2127_v47, 16  ;;  %v425_v63 = vshll.u32 %v2127_v47, 16  ;;  %v431_v57 = vshll.u32 %v2133_v14, 16 }
  0x60   : > { %v435_v9 = vshrl.u32 %v2133_v14, 16  ;;  %v246_v26 = vor.u32 %v245_v35, %v241_v20 }
  0x61   : > { %v237_v21 = vrot.slane %v236_v58, 4  ;;  %v424_v32 = vrot.slane %v422_v6, 4  ;;  %v427_v54 = vrot.slane %v425_v63, 5  ;;  %v433_v29 = vrot.slane %v431_v57, 5  ;;  %v1637_v6 = vld [vmem:[%s2534_s1 + $0x18] sm:$0xf] }
  0x62   : > { %1171 = vmatpush.bf16.xpose.msrb.mxu2 %v2111_v50  ;;  %v634_v50 = vunpack.c.l.b16 %v468_v17  ;;  %v437_v17 = vrot.slane %v435_v9, 4  ;;  %v247_v56 = vrot.slane %v246_v26, 4  ;;  %v968_v9 = vrot.slane %v1734_v3, 5 }
  0x63   : > { %1184 = vmatpush.bf16.xpose.msrb.mxu3 %v2118_v46  ;;  %v2141_v46 = vld [vmem:[%s1726_s17 + $0x68] sm:$0x1]  ;;  %v242_v24 = vsel %vm1769_vm3, %v237_v21, %v241_v20  ;;  %v1619_v21 = vrot.slane %v1750_v11, 9 }
  0x64   : > { %v656_v62 = vpack.c.b16 %v634_v50, %v633_v41  ;;  %v441_v44 = vshll.u32 %v2141_v46, 16  ;;  %v615_v14 = vunpack.c.l.b16 %v242_v24  ;;  %v428_v50 = vor.u32 %v427_v54, %v424_v32 }
  0x65   : > { %v438_v41 = vor.u32 %v437_v17, %v433_v29  ;;  %v252_v63 = vsel %vm1769_vm3, %v247_v56, %v251_v22  ;;  %v971_v54 = vrot.slane %v1737_v4, 5  ;;  %v970_v22 = vrot.slane %v968_v9, 4 }
  0x66   : > { %v2150_v53 = vsel %vm663_vm0, %v656_v62, 0  ;;  %v443_v1 = vrot.slane %v441_v44, 5  ;;  %v1611_v62 = vrot.slane %v1731_v2, 9  ;;  %v616_v20 = vunpack.c.l.b16 %v252_v63 }
  0x67   : > { %734 = vmatpush.bf16.xpose.msra.mxu1 %v2150_v53  ;;  %v429_v58 = vrot.slane %v428_v50, 4  ;;  %v439_v35 = vrot.slane %v438_v41, 4  ;;  %v1024_v2 = vrot.slane %v1756_v15, 5  ;;  %v972_v4 = vsel %vm2161_vm6, %v970_v22, %v971_v54 }
  0x68   : > { %v969_v57 = vsel %vm2161_vm6, %v1611_v62, %v968_v9  ;;  %v647_v3 = vpack.c.b16 %v616_v20, %v615_v14  ;;  %v1046_v50 = vunpack.c.l.b16 %v972_v4  ;;  %v1027_v14 = vrot.slane %v1760_v19, 5 }
  0x69   : > { %v434_v26 = vsel %vm1769_vm3, %v429_v58, %v433_v29  ;;  %v444_v44 = vsel %vm1769_vm3, %v439_v35, %v443_v1  ;;  %v1045_v32 = vunpack.c.l.b16 %v969_v57  ;;  %v1025_v56 = vsel %vm2161_vm6, %v1619_v21, %v1024_v2 }
  0x6a   : > { %1172 = vmatpush.bf16.xpose.msrb.mxu2 %v1742_v7  ;;  %v631_v17 = vunpack.c.l.b16 %v434_v26  ;;  %v632_v24 = vunpack.c.l.b16 %v444_v44  ;;  %v668_v11 = vsel %vm663_vm0, %v647_v3, 0  ;;  %v1026_v15 = vrot.slane %v1024_v2, 4 }
  0x6b   : > { %1185 = vmatpush.bf16.xpose.msrb.mxu3 %v1745_v8  ;;  %722 = vmatpush.bf16.xpose.msra.mxu0 %v668_v11  ;;  %v1061_v41 = vunpack.c.l.b16 %v1025_v56  ;;  %v1610_v1 = vrot.slane %v1775_v33, 9  ;;  %v961_v63 = vrot.slane %v1784_v38, 5  ;;  %v1070_v62 = vpack.c.b16 %v1046_v50, %v1045_v32 }
  0x6c   : > { %v655_v29 = vpack.c.b16 %v632_v24, %v631_v17  ;;  %v1028_v9 = vsel %vm2161_vm6, %v1026_v15, %v1027_v14  ;;  %v964_v20 = vrot.slane %v1790_v45, 5  ;;  %v1618_v58 = vrot.slane %v1795_v48, 9 }
  0x6d   : > { %v1062_v19 = vunpack.c.l.b16 %v1028_v9  ;;  %v962_v54 = vsel %vm2161_vm6, %v1610_v1, %v961_v63  ;;  %v963_v33 = vrot.slane %v961_v63, 4  ;;  %v2195_v38 = vsel %vm663_vm0, %v1070_v62, 0 }
  0x6e   : > { %v2188_v35 = vsel %vm663_vm0, %v655_v29, 0  ;;  %v1043_v45 = vunpack.c.l.b16 %v962_v54  ;;  %v1017_v48 = vrot.slane %v1806_v60, 5  ;;  %v1020_v57 = vrot.slane %v1812_v5, 5 }
  0x6f   : > { %735 = vmatpush.bf16.xpose.msra.mxu1 %v2188_v35  ;;  %v1078_v22 = vpack.c.b16 %v1062_v19, %v1061_v41  ;;  %v965_v21 = vsel %vm2161_vm6, %v963_v33, %v964_v20  ;;  %v1609_v2 = vrot.slane %v1825_v25, 9  ;;  %v954_v3 = vrot.slane %v1833_v31, 5 }
  0x70   : > { %v1044_v26 = vunpack.c.l.b16 %v965_v21  ;;  %v1018_v44 = vsel %vm2161_vm6, %v1618_v58, %v1017_v48  ;;  %v1019_v32 = vrot.slane %v1017_v48, 4  ;;  %v957_v17 = vrot.slane %v1844_v43, 5 }
  0x71   : > { %v2208_v60 = vsel %vm663_vm0, %v1078_v22, 0  ;;  %v1059_v5 = vunpack.c.l.b16 %v1018_v44  ;;  %v955_v24 = vsel %vm2161_vm6, %v1609_v2, %v954_v3  ;;  %v956_v4 = vrot.slane %v954_v3, 4  ;;  %v225_v44 = vld [vmem:[%s2534_s1] sm:$0xf] }
  0x72   : > { %1173 = vmatpush.bf16.xpose.msrb.mxu2 %v1778_v36  ;;  %v1069_v25 = vpack.c.b16 %v1044_v26, %v1043_v45  ;;  %v1021_v31 = vsel %vm2161_vm6, %v1019_v32, %v1020_v57  ;;  %v1041_v56 = vunpack.c.l.b16 %v955_v24  ;;  %v1617_v11 = vrot.slane %v1853_v51, 9  ;;  %1603 = vmatmul.msk.bf16.vlgmr.msra.gmra.mxu3 %vm663_vm0, %v225_v44 }
  0x73   : > { %1186 = vmatpush.bf16.xpose.msrb.mxu3 %v1781_v37  ;;  %1130 = vmatpush.bf16.xpose.msrb.mxu0 %v2195_v38  ;;  %v1060_v50 = vunpack.c.l.b16 %v1021_v31  ;;  %v958_v43 = vsel %vm2161_vm6, %v956_v4, %v957_v17  ;;  %v1010_v15 = vrot.slane %v1860_v0, 5  ;;  %v1013_v14 = vrot.slane %v1867_v16, 5 }
  0x74   : > { %v2221_v29 = vsel %vm663_vm0, %v1069_v25, 0  ;;  %v1042_v41 = vunpack.c.l.b16 %v958_v43  ;;  %v1608_v1 = vrot.slane %v1882_v40, 9  ;;  %v947_v63 = vrot.slane %v1888_v49, 5  ;;  %1602 = vmatmul.msk.bf16.vlgmr.msra.gmra.mxu2 %vm663_vm0, %v225_v44  ;;  %v2632_v43 = vld [vmem:[#allocation11_spill] sm:$0xff] }
  0x75   : > { %v1077_v62 = vpack.c.b16 %v1060_v50, %v1059_v5  ;;  %v1011_v51 = vsel %vm2161_vm6, %v1617_v11, %v1010_v15  ;;  %v1012_v9 = vrot.slane %v1010_v15, 4  ;;  %v950_v0 = vrot.slane %v1896_v55, 5 }
  0x76   : > { %v1068_v16 = vpack.c.b16 %v1042_v41, %v1041_v56  ;;  %v948_v20 = vsel %vm2161_vm6, %v1608_v1, %v947_v63  ;;  %v949_v58 = vrot.slane %v947_v63, 4  ;;  %v1057_v19 = vunpack.c.l.b16 %v1011_v51 }
  0x77   : > { %1143 = vmatpush.bf16.xpose.msrb.mxu1 %v2208_v60  ;;  %v2234_v40 = vsel %vm663_vm0, %v1077_v62, 0  ;;  %v1014_v49 = vsel %vm2161_vm6, %v1012_v9, %v1013_v14  ;;  %v1616_v54 = vrot.slane %v1909_v13, 9  ;;  %v1039_v45 = vunpack.c.l.b16 %v948_v20  ;;  %v2633_v14 = vld [vmem:[#allocation13_spill] sm:$0xff]  ;;  %v2634_v62 = vld [vmem:[#allocation15_spill] sm:$0xff] }
  0x78   : > { %v1058_v33 = vunpack.c.l.b16 %v1014_v49  ;;  %v951_v55 = vsel %vm2161_vm6, %v949_v58, %v950_v0  ;;  %v1003_v48 = vrot.slane %v1912_v23, 5  ;;  %v1006_v22 = vrot.slane %v1922_v34, 5  ;;  %v1535_v23 = vld [vmem:[%s2534_s1 + $0x4] sm:$0xf]  ;;  %v2635_v49 = vld [vmem:[#allocation17_spill] sm:$0xff] }
  0x79   : > { %v1040_v57 = vunpack.c.l.b16 %v951_v55  ;;  %v1607_v21 = vrot.slane %v1933_v12, 9  ;;  %v940_v2 = vrot.slane %v1943_v27, 5  ;;  %v943_v26 = vrot.slane %v1947_v52, 5  ;;  %1536 = vmatmul.msk.bf16.vlgmr.msra.gmra.mxu0 %vm663_vm0, %v1535_v23  ;;  %1537 = vmatmul.msk.bf16.vlgmr.msra.gmra.mxu1 %vm663_vm0, %v1535_v23  ;;  %v2640_v23 = vld [vmem:[#allocation8_spill] sm:$0xff] }
  0x7a   : > { %1174 = vmatpush.bf16.xpose.msrb.mxu2 %v1830_v30  ;;  %v1004_v3 = vsel %vm2161_vm6, %v1616_v54, %v1003_v48  ;;  %v1005_v13 = vrot.slane %v1003_v48, 4  ;;  %v2256_v34 = vsel %vm663_vm0, %v1068_v16, 0  ;;  %v1076_v12 = vpack.c.b16 %v1058_v33, %v1057_v19 }
  0x7b   : > { %1187 = vmatpush.bf16.xpose.msrb.mxu3 %v1841_v42  ;;  %1131 = vmatpush.bf16.xpose.msrb.mxu0 %v2221_v29  ;;  %v941_v27 = vsel %vm2161_vm6, %v1607_v21, %v940_v2  ;;  %v942_v32 = vrot.slane %v940_v2, 4  ;;  %v1067_v52 = vpack.c.b16 %v1040_v57, %v1039_v45  ;;  %v1615_v24 = vrot.slane %v1961_v61, 9  ;;  %v2636_v45 = vld [vmem:[#allocation18_spill] sm:$0xff]  ;;  %v2638_v2 = vld [vmem:[#allocation21_spill] sm:$0xff] }
  0x7c   : > { %v1007_v17 = vsel %vm2161_vm6, %v1005_v13, %v1006_v22  ;;  %v1037_v5 = vunpack.c.l.b16 %v941_v27  ;;  %v1055_v4 = vunpack.c.l.b16 %v1004_v3  ;;  %v996_v56 = vrot.slane %v1966_v10, 5  ;;  %v2637_v22 = vld [vmem:[#allocation19_spill] sm:$0xff]  ;;  %v2639_v13 = vld [vmem:[#allocation24_spill] sm:$0xff] }
  0x7d   : > { %v1056_v25 = vunpack.c.l.b16 %v1007_v17  ;;  %v944_v31 = vsel %vm2161_vm6, %v942_v32, %v943_v26  ;;  %v999_v50 = vrot.slane %v1977_v18, 5  ;;  %v1606_v15 = vrot.slane %v2632_v43, 9  ;;  %v2641_v32 = vld [vmem:[#allocation25_spill] sm:$0xff] }
  0x7e   : > { %v1038_v11 = vunpack.c.l.b16 %v944_v31  ;;  %v933_v61 = vrot.slane %v2633_v14, 5  ;;  %v2277_v41 = vsel %vm663_vm0, %v1076_v12, 0  ;;  %v997_v1 = vsel %vm2161_vm6, %v1615_v24, %v996_v56  ;;  %v2642_v17 = vld [vmem:[#allocation9_spill] sm:$0xff] }
  0x7f   : > { %1144 = vmatpush.bf16.xpose.msrb.mxu1 %v2234_v40  ;;  %v998_v63 = vrot.slane %v996_v56, 4  ;;  %v936_v10 = vrot.slane %v2634_v62, 5  ;;  %v1053_v9 = vunpack.c.l.b16 %v997_v1  ;;  %v2285_v16 = vsel %vm663_vm0, %v1067_v52, 0  ;;  %v2645_v62 = vld [vmem:[#allocation30_spill] sm:$0xff] }
  0x80   : > { %v1066_v51 = vpack.c.b16 %v1038_v11, %v1037_v5  ;;  %v934_v18 = vsel %vm2161_vm6, %v1606_v15, %v933_v61  ;;  %v935_v0 = vrot.slane %v933_v61, 4  ;;  %v1614_v19 = vrot.slane %v2635_v49, 9  ;;  %v2643_v11 = vld [vmem:[#allocation27_spill] sm:$0xff]  ;;  %v2644_v61 = vld [vmem:[#allocation28_spill] sm:$0xff] }
  0x81   : > { %v1000_v20 = vsel %vm2161_vm6, %v998_v63, %v999_v50  ;;  %v1035_v58 = vunpack.c.l.b16 %v934_v18  ;;  %v1075_v54 = vpack.c.b16 %v1056_v25, %v1055_v4  ;;  %v989_v48 = vrot.slane %v2636_v45, 5  ;;  %v2646_v18 = vld [vmem:[#allocation37_spill] sm:$0xff] }
  0x82   : > { %1175 = vmatpush.bf16.xpose.msrb.mxu2 %v1879_v39  ;;  %v1054_v33 = vunpack.c.l.b16 %v1000_v20  ;;  %v937_v55 = vsel %vm2161_vm6, %v935_v0, %v936_v10  ;;  %v992_v21 = vrot.slane %v2637_v22, 5  ;;  %v1605_v3 = vrot.slane %v2638_v2, 9 }
  0x83   : > { %1188 = vmatpush.bf16.xpose.msrb.mxu3 %v1900_v59  ;;  %1132 = vmatpush.bf16.xpose.msrb.mxu0 %v2256_v34  ;;  %v1036_v57 = vunpack.c.l.b16 %v937_v55  ;;  %v926_v26 = vrot.slane %v2639_v13, 5  ;;  %v990_v12 = vsel %vm2161_vm6, %v1614_v19, %v989_v48  ;;  %v991_v27 = vrot.slane %v989_v48, 4  ;;  %v2647_v13 = vld [vmem:[#allocation14_spill] sm:$0xff] }
  0x84   : > { %v1074_v44 = vpack.c.b16 %v1054_v33, %v1053_v9  ;;  %v929_v52 = vrot.slane %v2641_v32, 5  ;;  %v1051_v24 = vunpack.c.l.b16 %v990_v12  ;;  %v1613_v50 = vrot.slane %v2643_v11, 9  ;;  %v2648_v32 = vld [vmem:[#allocation16_spill] sm:$0xff] }
  0x85   : > { %v2302_v5 = vpack.c.b16 %v1036_v57, %v1035_v58  ;;  %v927_v4 = vsel %vm2161_vm6, %v1605_v3, %v926_v26  ;;  %v928_v25 = vrot.slane %v926_v26, 4  ;;  %v993_v31 = vsel %vm2161_vm6, %v991_v27, %v992_v21  ;;  %v221_v57 = vld [vmem:[%s1726_s17 + $0xc8] sm:$0x1] }
  0x86   : > { %v1033_v56 = vunpack.c.l.b16 %v927_v4  ;;  %v2311_v43 = vsel %vm663_vm0, %v1075_v54, 0  ;;  %v1052_v15 = vunpack.c.l.b16 %v993_v31  ;;  %v982_v1 = vrot.slane %v2644_v61, 5  ;;  %v220_v54 = vld [vmem:[%s1726_s17 + $0xc4] sm:$0xf] }
  0x87   : > { %1145 = vmatpush.bf16.xpose.msrb.mxu1 %v2277_v41  ;;  %v930_v14 = vsel %vm2161_vm6, %v928_v25, %v929_v52  ;;  %v985_v10 = vrot.slane %v2645_v62, 5  ;;  %v1612_v9 = vrot.slane %v2127_v47, 9  ;;  %v975_v0 = vrot.slane %v2646_v18, 5  ;;  %v219_v47 = vld [vmem:[%s1726_s17 + $0xc0] sm:$0xf]  ;;  %v2650_v25 = vld [vmem:[#allocation33_spill] sm:$0xff] }
  0x88   : > { %v1034_v63 = vunpack.c.l.b16 %v930_v14  ;;  %v1073_v20 = vpack.c.b16 %v1052_v15, %v1051_v24  ;;  %v983_v58 = vsel %vm2161_vm6, %v1613_v50, %v982_v1  ;;  %v984_v49 = vrot.slane %v982_v1, 4  ;;  %v2649_v24 = vld [vmem:[#allocation32_spill] sm:$0xff]  ;;  %v2651_v50 = vld [vmem:[#allocation35_spill] sm:$0xff] }
  0x89   : > { %v978_v19 = vrot.slane %v2141_v46, 5  ;;  %v1049_v55 = vunpack.c.l.b16 %v983_v58  ;;  %v976_v45 = vsel %vm2161_vm6, %v1612_v9, %v975_v0  ;;  %v977_v48 = vrot.slane %v975_v0, 4 }
  0x8a   : > { %1176 = vmatpush.bf16.xpose.msrb.mxu2 %v2640_v23  ;;  %v2324_v33 = vpack.c.b16 %v1034_v63, %v1033_v56  ;;  %v2331_v22 = vsel %vm663_vm0, %v1066_v51, 0  ;;  %v986_v21 = vsel %vm2161_vm6, %v984_v49, %v985_v10  ;;  %v1047_v2 = vunpack.c.l.b16 %v976_v45 }
  0x8b   : > { %1189 = vmatpush.bf16.xpose.msrb.mxu3 %v2642_v17  ;;  %1133 = vmatpush.bf16.xpose.msrb.mxu0 %v2285_v16  ;;  %v1633_v46 = vrot.slane %v219_v47, 9  ;;  %v2336_v3 = vsel %vm663_vm0, %v1074_v44, 0  ;;  %v1050_v26 = vunpack.c.l.b16 %v986_v21  ;;  %v979_v12 = vsel %vm2161_vm6, %v977_v48, %v978_v19 }
  0x8c   : > { %v1265_v27 = vrot.slane %v220_v54, 5  ;;  %v1048_v52 = vunpack.c.l.b16 %v979_v12  ;;  %v1268_v51 = vrot.slane %v221_v57, 5  ;;  %v1604_v4 = vrot.slane %v2649_v24, 9 }
  0x8d   : > { %v919_v31 = vrot.slane %v2650_v25, 5  ;;  %v1072_v56 = vpack.c.b16 %v1050_v26, %v1049_v55  ;;  %v922_v15 = vrot.slane %v2651_v50, 5  ;;  %v1200_v9 = vshrl.u32 %v219_v47, 16  ;;  %v2652_v26 = vld [vmem:[#allocation23_spill] sm:$0xff] }
  0x8e   : > { %v1266_v44 = vsel %vm2161_vm6, %v1633_v46, %v1265_v27  ;;  %v1267_v11 = vrot.slane %v1265_v27, 4  ;;  %v1071_v14 = vpack.c.b16 %v1048_v52, %v1047_v2  ;;  %v1203_v49 = vshll.u32 %v219_v47, 16  ;;  %v1623_v25 = vld [vmem:[%s2534_s1 + $0xc] sm:$0xf] }
  0x8f   : > { %1146 = vmatpush.bf16.xpose.msrb.mxu1 %v2311_v43  ;;  %v1272_v61 = vunpack.c.l.b16 %v1266_v44  ;;  %v920_v1 = vsel %vm2161_vm6, %v1604_v4, %v919_v31  ;;  %v921_v63 = vrot.slane %v919_v31, 4  ;;  %v1202_v55 = vrot.slane %v1200_v9, 4  ;;  %v2409_v9 = vld [vmem:[%s1726_s17 + $0xd0] sm:$0xf] }
  0x90   : > { %v1269_v62 = vsel %vm2161_vm6, %v1267_v11, %v1268_v51  ;;  %v1031_v10 = vunpack.c.l.b16 %v920_v1  ;;  %v2353_v18 = vsel %vm663_vm0, %v1071_v14, 0  ;;  %v1209_v45 = vshll.u32 %v220_v54, 16  ;;  %v2653_v51 = vld [vmem:[#allocation26_spill] sm:$0xff] }
  0x91   : > { %v1273_v0 = vunpack.c.l.b16 %v1269_v62  ;;  %v923_v58 = vsel %vm2161_vm6, %v921_v63, %v922_v15  ;;  %v1213_v48 = vshrl.u32 %v220_v54, 16  ;;  %v1205_v2 = vrot.slane %v1203_v49, 5  ;;  %v2654_v62 = vld [vmem:[#allocation2_spill] sm:$0xff] }
  0x92   : > { %1177 = vmatpush.bf16.xpose.msrb.mxu2 %v2647_v13  ;;  %v1032_v19 = vunpack.c.l.b16 %v923_v58  ;;  %v2360_v46 = vsel %vm663_vm0, %v2302_v5, 0  ;;  %v1211_v27 = vrot.slane %v1209_v45, 5  ;;  %v1219_v54 = vshll.u32 %v221_v57, 16 }
  0x93   : > { %1190 = vmatpush.bf16.xpose.msrb.mxu3 %v2648_v32  ;;  %1134 = vmatpush.bf16.xpose.msrb.mxu0 %v2331_v22  ;;  %v1274_v21 = vpack.c.b16 %v1273_v0, %v1272_v61  ;;  %v1215_v52 = vrot.slane %v1213_v48, 4  ;;  %v1206_v24 = vor.u32 %v1205_v2, %v1202_v55  ;;  %v2371_v5 = vsel %vm663_vm0, %v1073_v20, 0  ;;  %v2655_v55 = vld [vmem:[#allocation3_spill] sm:$0xff] }
  0x94   : > { %v1063_v12 = vpack.c.b16 %v1032_v19, %v1031_v10  ;;  %v1221_v11 = vrot.slane %v1219_v54, 5  ;;  %v1086_v57 = vsel %vm663_vm0, %v2324_v33, 0  ;;  %v2388_v15 = vsel %vm663_vm0, %v1072_v56, 0  ;;  %v1620_v56 = vld [vmem:[%s2534_s1 + $0x8] sm:$0xf]  ;;  %v2657_v54 = vld [vmem:[#allocation5_spill] sm:$0xff] }
  0x95   : > { %v2366_v47 = vsel %vm663_vm0, %v1274_v21, 0  ;;  %v1216_v4 = vor.u32 %v1215_v52, %v1211_v27  ;;  %v1207_v31 = vrot.slane %v1206_v24, 4  ;;  %v2406_v10 = vld [vmem:[%s1726_s17 + $0xcc] sm:$0xf]  ;;  %v1360_v49 = vshll.u32 %v2409_v9, 16 }
  0x96   : > { %v1083_v33 = vsel %vm663_vm0, %v1063_v12, 0  ;;  %v1351_v0 = vshrl.u32 %v2406_v10, 16  ;;  %v1354_v58 = vshll.u32 %v2406_v10, 16  ;;  %v1364_v19 = vshrl.u32 %v2409_v9, 16  ;;  %v2656_v12 = vld [vmem:[#allocation4_spill] sm:$0xff] }
  0x97   : > { %1147 = vmatpush.bf16.xpose.msrb.mxu1 %v2336_v3  ;;  %v1217_v44 = vrot.slane %v1216_v4, 4  ;;  %v1212_v20 = vsel %vm1769_vm3, %v1207_v31, %v1211_v27  ;;  %v1362_v21 = vrot.slane %v1360_v49, 5  ;;  %v2663_v49 = vld [vmem:[#allocation22_spill] sm:$0xff] }
  0x98   : > { %v1225_v14 = vunpack.c.l.b16 %v1212_v20  ;;  %v1353_v45 = vrot.slane %v1351_v0, 4  ;;  %v1356_v48 = vrot.slane %v1354_v58, 5  ;;  %v1366_v2 = vrot.slane %v1364_v19, 4  ;;  %v1634_v58 = vld [vmem:[%s2534_s1 + $0x14] sm:$0xf]  ;;  %v2665_v19 = vld [vmem:[#allocation31_spill] sm:$0xff] }
  0x99   : > { %v1222_v50 = vsel %vm1769_vm3, %v1217_v44, %v1221_v11  ;;  %v2658_v44 = vld [vmem:[#allocation6_spill] sm:$0xff] }
  0x9a   : > { %1178 = vmatpush.bf16.xpose.msrb.mxu2 %v2652_v26  ;;  %v1226_v61 = vunpack.c.l.b16 %v1222_v50  ;;  %v2419_v26 = vld [vmem:[%s1726_s17 + $0xd4] sm:$0x1]  ;;  %v1357_v27 = vor.u32 %v1356_v48, %v1353_v45  ;;  %v1367_v52 = vor.u32 %v1366_v2, %v1362_v21  ;;  %v2659_v50 = vld [vmem:[#allocation7_spill] sm:$0xff]  ;;  %v2666_v48 = vld [vmem:[#allocation38_spill] sm:$0xff] }
  0x9b   : > { %1191 = vmatpush.bf16.xpose.msrb.mxu3 %v2653_v51  ;;  %1135 = vmatpush.bf16.xpose.msrb.mxu0 %v2360_v46  ;;  %v1370_v24 = vshll.u32 %v2419_v26, 16  ;;  %v1671_v45 = vld [vmem:[%s1726_s17 + $0xcc] sm:$0xff] }
  0x9c   : > { %v1227_v1 = vpack.c.b16 %v1226_v61, %v1225_v14  ;;  %v1358_v4 = vrot.slane %v1357_v27, 4 }
  0x9d   : > { %v1372_v31 = vrot.slane %v1370_v24, 5  ;;  %v1644_v24 = vld [vmem:[%s2534_s1 + $0x1c] sm:$0xf] }
  0x9e   : > { %v1232_v63 = vsel %vm663_vm0, %v1227_v1, 0  ;;  %v1363_v11 = vsel %vm1769_vm3, %v1358_v4, %v1362_v21  ;;  %v1320_v21 = vsel %vm663_vm0, %v1671_v45, 0 }
  0x9f   : > { %1148 = vmatpush.bf16.xpose.msrb.mxu1 %v2371_v5  ;;  %v1376_v14 = vunpack.c.l.b16 %v1363_v11 }
  0xa1   : > { %1628 = vmatmul.msk.bf16.vlgmr.msrb.gmra.mxu2 %vm663_vm0, %v1623_v25 }
  0xa2   : > { %1281 = vmatpush.bf16.xpose.msra.mxu2 %v2353_v18  ;;  %1629 = vmatmul.msk.bf16.vlgmr.msrb.gmra.mxu3 %vm663_vm0, %v1623_v25  ;;  %v1368_v25 = vrot.slane %v1367_v52, 4  ;;  %v1416_v52 = vrot.slane %v2409_v9, 5 }
  0xa3   : > { %1294 = vmatpush.bf16.xpose.msra.mxu3 %v2366_v47  ;;  %1136 = vmatpush.bf16.xpose.msrb.mxu0 %v1086_v57 }
  0xa4   : > { %v1373_v20 = vsel %vm1769_vm3, %v1368_v25, %v1372_v31 }
  0xa5   : > { %v1377_v61 = vunpack.c.l.b16 %v1373_v20 }
  0xa7   : > { %1149 = vmatpush.bf16.xpose.msrb.mxu1 %v2388_v15  ;;  %v1378_v1 = vpack.c.b16 %v1377_v61, %v1376_v14 }
  0xa9   : > { %v1383_v0 = vsel %vm663_vm0, %v1378_v1, 0 }
  0xaa   : > { %1282 = vmatpush.bf16.xpose.msra.mxu2 %v2195_v38 }
  0xab   : > { %1295 = vmatpush.bf16.xpose.msra.mxu3 %v2208_v60  ;;  %1137 = vmatpush.bf16.xpose.msrb.mxu0 %v1083_v33  ;;  %v2660_v33 = vld [vmem:[#allocation10_spill] sm:$0xff] }
  0xaf   : > { %1150 = vmatpush.bf16.xpose.msrb.mxu1 %v2353_v18 }
  0xb2   : > { %1283 = vmatpush.bf16.xpose.msra.mxu2 %v2221_v29  ;;  %1621 = vmatmul.msk.bf16.vlgmr.msrb.gmra.mxu0 %vm663_vm0, %v1620_v56 }
  0xb3   : > { %1296 = vmatpush.bf16.xpose.msra.mxu3 %v2234_v40  ;;  %1234 = vmatpush.bf16.xpose.msra.mxu0 %v2188_v35 }
  0xb6   : > { %1622 = vmatmul.msk.bf16.vlgmr.msrb.gmra.mxu1 %vm663_vm0, %v1620_v56  ;;  %v2661_v56 = vld [vmem:[#allocation12_spill] sm:$0xff] }
  0xb7   : > { %1247 = vmatpush.bf16.xpose.msra.mxu1 %v1232_v63 }
  0xba   : > { %1284 = vmatpush.bf16.xpose.msra.mxu2 %v2256_v34 }
  0xbb   : > { %1297 = vmatpush.bf16.xpose.msra.mxu3 %v2277_v41  ;;  %1235 = vmatpush.bf16.xpose.msra.mxu0 %v2654_v62 }
  0xbf   : > { %1248 = vmatpush.bf16.xpose.msra.mxu1 %v2655_v55 }
  0xc2   : > { %1285 = vmatpush.bf16.xpose.msra.mxu2 %v2285_v16 }
  0xc3   : > { %1298 = vmatpush.bf16.xpose.msra.mxu3 %v2311_v43  ;;  %1236 = vmatpush.bf16.xpose.msra.mxu0 %v2656_v12 }
  0xc7   : > { %1249 = vmatpush.bf16.xpose.msra.mxu1 %v2657_v54 }
  0xca   : > { %1286 = vmatpush.bf16.xpose.msra.mxu2 %v2331_v22 }
  0xcb   : > { %1299 = vmatpush.bf16.xpose.msra.mxu3 %v2336_v3  ;;  %1237 = vmatpush.bf16.xpose.msra.mxu0 %v2658_v44 }
  0xcf   : > { %1250 = vmatpush.bf16.xpose.msra.mxu1 %v2659_v50 }
  0xd2   : > { %1287 = vmatpush.bf16.xpose.msra.mxu2 %v2360_v46 }
  0xd3   : > { %1300 = vmatpush.bf16.xpose.msra.mxu3 %v2371_v5  ;;  %1238 = vmatpush.bf16.xpose.msra.mxu0 %v2660_v33 }
  0xd7   : > { %1251 = vmatpush.bf16.xpose.msra.mxu1 %v2661_v56 }
  0xda   : > { %1288 = vmatpush.bf16.xpose.msra.mxu2 %v1086_v57  ;;  %v2664_v57 = vld [vmem:[#allocation29_spill] sm:$0xff] }
  0xdb   : > { %1301 = vmatpush.bf16.xpose.msra.mxu3 %v2388_v15  ;;  %1239 = vmatpush.bf16.xpose.msra.mxu0 %v2662_v28 }
  0xdf   : > { %1252 = vmatpush.bf16.xpose.msra.mxu1 %v2663_v49 }
  0xe1   : > { %1635 = vmatmul.msk.bf16.vlgmr.msra.gmra.mxu2 %vm663_vm0, %v1634_v58 }
  0xe2   : > { %1385 = vmatpush.bf16.xpose.msrb.mxu2 %v2150_v53  ;;  %1636 = vmatmul.msk.bf16.vlgmr.msra.gmra.mxu3 %vm663_vm0, %v1634_v58 }
  0xe3   : > { %1398 = vmatpush.bf16.xpose.msrb.mxu3 %v1383_v0  ;;  %1240 = vmatpush.bf16.xpose.msra.mxu0 %v2664_v57 }
  0xe7   : > { %1253 = vmatpush.bf16.xpose.msra.mxu1 %v2665_v19 }
  0xea   : > { %1386 = vmatpush.bf16.xpose.msrb.mxu2 %v2188_v35  ;;  %v1630_v35 = vld [vmem:[%s2534_s1 + $0x10] sm:$0xf] }
  0xeb   : > { %1399 = vmatpush.bf16.xpose.msrb.mxu3 %v1232_v63  ;;  %1241 = vmatpush.bf16.xpose.msra.mxu0 %v2666_v48  ;;  %v2667_v63 = vld [vmem:[#allocation34_spill] sm:$0xff] }
  0xef   : > { %1254 = vmatpush.bf16.xpose.msra.mxu1 %v2150_v53 }
  0xf2   : > { %1387 = vmatpush.bf16.xpose.msrb.mxu2 %v2654_v62  ;;  %1631 = vmatmul.msk.bf16.vlgmr.msra.gmra.mxu0 %vm663_vm0, %v1630_v35 }
  0xf3   : > { %1400 = vmatpush.bf16.xpose.msrb.mxu3 %v2655_v55  ;;  %1322 = vmatpush.bf16.xpose.msrb.mxu0 %v2653_v51  ;;  %v2668_v51 = vld [vmem:[#allocation36_spill] sm:$0xff] }
  0xf5   : > { %v894_v2 = vpop.f32.mrf.mxu3 }
  0xf6   : > { %1632 = vmatmul.msk.bf16.vlgmr.msra.gmra.mxu1 %vm663_vm0, %v1630_v35  ;;  %v724_v53 = vpop.f32.mrf.mxu0  ;;  %v737_v62 = vpop.f32.mrf.mxu1 }
  0xf7   : > { %1335 = vmatpush.bf16.xpose.msrb.mxu1 %v1320_v21  ;;  %v881_v55 = vpop.f32.mrf.mxu2 }
  0xfa   : > { %1388 = vmatpush.bf16.xpose.msrb.mxu2 %v2656_v12  ;;  %v882_v12 = vadd.f32 %v881_v55, %v724_v53 }
  0xfb   : > { %1401 = vmatpush.bf16.xpose.msrb.mxu3 %v2657_v54  ;;  %1323 = vmatpush.bf16.xpose.msrb.mxu0 %v2667_v63  ;;  %v1418_v54 = vrot.slane %v1416_v52, 4 }
  0xfe   : > { %v739_v27 = vpop.f32.mrf.mxu1 }
  0xff   : > { %1336 = vmatpush.bf16.xpose.msrb.mxu1 %v2668_v51 }
 0x102   : > { %1389 = vmatpush.bf16.xpose.msrb.mxu2 %v2658_v44 }
 0x103   : > { %1402 = vmatpush.bf16.xpose.msrb.mxu3 %v2659_v50  ;;  %1324 = vmatpush.bf16.xpose.msrb.mxu0 %v1742_v7  ;;  %v895_v7 = vadd.f32 %v894_v2, %v737_v62 }
 0x107   : > { %1337 = vmatpush.bf16.xpose.msrb.mxu1 %v1745_v8  ;;  %v726_v8 = vpop.f32.mrf.mxu0 }
 0x10a   : > { %1390 = vmatpush.bf16.xpose.msrb.mxu2 %v2660_v33 }
 0x10b   : > { %1403 = vmatpush.bf16.xpose.msrb.mxu3 %v2661_v56  ;;  %1325 = vmatpush.bf16.xpose.msrb.mxu0 %v1778_v36  ;;  %v883_v36 = vpop.f32.mrf.mxu2 }
 0x10f   : > { %1338 = vmatpush.bf16.xpose.msrb.mxu1 %v1781_v37  ;;  %v896_v37 = vpop.f32.mrf.mxu3 }
 0x112   : > { %1391 = vmatpush.bf16.xpose.msrb.mxu2 %v2662_v28 }
 0x113   : > { %1404 = vmatpush.bf16.xpose.msrb.mxu3 %v2663_v49  ;;  %1326 = vmatpush.bf16.xpose.msrb.mxu0 %v1830_v30  ;;  %v1647_v30 = vrot.slane %v2406_v10, 9 }
 0x115   : > { %v1417_v9 = vsel %vm2161_vm6, %v1647_v30, %v1416_v52 }
 0x116   : > { %v1423_v4 = vunpack.c.l.b16 %v1417_v9 }
 0x117   : > { %1339 = vmatpush.bf16.xpose.msrb.mxu1 %v1841_v42  ;;  %v1419_v42 = vrot.slane %v2419_v26, 5 }
 0x11a   : > { %1392 = vmatpush.bf16.xpose.msrb.mxu2 %v2664_v57 }
 0x11b   : > { %1405 = vmatpush.bf16.xpose.msrb.mxu3 %v2665_v19  ;;  %1327 = vmatpush.bf16.xpose.msrb.mxu0 %v1879_v39  ;;  %v1420_v39 = vsel %vm2161_vm6, %v1418_v54, %v1419_v42 }
 0x11c   : > { %v1424_v25 = vunpack.c.l.b16 %v1420_v39 }
 0x11e   : > { %v1425_v10 = vpack.c.b16 %v1424_v25, %v1423_v4 }
 0x11f   : > { %1340 = vmatpush.bf16.xpose.msrb.mxu1 %v1900_v59 }
 0x120   : > { %v1430_v59 = vsel %vm663_vm0, %v1425_v10, 0 }
 0x121   : > { %1645 = vmatmul.msk.bf16.vlgmr.msrb.gmra.mxu2 %vm663_vm0, %v1644_v24 }
 0x122   : > { %1646 = vmatmul.msk.bf16.vlgmr.msrb.gmra.mxu3 %vm663_vm0, %v1644_v24 }
 0x123   : > { %1328 = vmatpush.bf16.xpose.msrb.mxu0 %v2640_v23 }
 0x124   : > { %v1180_v26 = vpop.f32.mrf.mxu2 }
 0x125   : > { %v1193_v23 = vpop.f32.mrf.mxu3 }
 0x127   : > { %1341 = vmatpush.bf16.xpose.msrb.mxu1 %v2642_v17 }
 0x12b   : > { %1329 = vmatpush.bf16.xpose.msrb.mxu0 %v2647_v13 }
 0x12c   : > { %v1182_v17 = vpop.f32.mrf.mxu2 }
 0x12d   : > { %v1195_v13 = vpop.f32.mrf.mxu3 }
 0x12f   : > { %1342 = vmatpush.bf16.xpose.msrb.mxu1 %v2648_v32  ;;  %v1139_v32 = vpop.f32.mrf.mxu0 }
 0x132   : > { %1642 = vmatmul.msk.bf16.vlgmr.msrb.gmra.mxu0 %vm663_vm0, %v1637_v6 }
 0x133   : > { %1432 = vmatpush.bf16.xpose.msra.mxu0 %v2388_v15  ;;  %v1156_v15 = vadd.f32 %v1139_v32, %v882_v12  ;;  %v1152_v31 = vpop.f32.mrf.mxu1 }
 0x134   : > { %v1157_v11 = vadd.f32 %v1152_v31, %v895_v7 }
 0x135   : > { %v1197_v44 = vadd.f32 %v1180_v26, %v1156_v15 }
 0x136   : > { %1643 = vmatmul.msk.bf16.vlgmr.msrb.gmra.mxu1 %vm663_vm0, %v1637_v6  ;;  %v1198_v20 = vadd.f32 %v1193_v23, %v1157_v11 }
 0x137   : > { %1445 = vmatpush.bf16.xpose.msra.mxu1 %v1430_v59  ;;  %v1141_v50 = vpop.f32.mrf.mxu0 }
 0x13b   : > { %1433 = vmatpush.bf16.xpose.msra.mxu0 %v2353_v18  ;;  %v1154_v18 = vpop.f32.mrf.mxu1 }
 0x13f   : > { %1446 = vmatpush.bf16.xpose.msra.mxu1 %v2366_v47 }
 0x143   : > { %1434 = vmatpush.bf16.xpose.msra.mxu0 %v2195_v38  ;;  %v1691_v38 = vmov 0  }
 0x144   : > { %1682 = vset.pattern.permute.xlu0 %v1691_v38 }
 0x147   : > { %1447 = vmatpush.bf16.xpose.msra.mxu1 %v2208_v60  ;;  %v1460_v60 = vld [vmem:[%s2535_s2] sm:$0xff] }
 0x148   : > { %1463 = vperm.xlu0 %1682, %v1460_v60  }
 0x14b   : > { %1435 = vmatpush.bf16.xpose.msra.mxu0 %v2221_v29  ;;  %v1648_v29 = vld [vmem:[%s2534_s1 + $0x20] sm:$0xf] }
 0x14f   : > { %1448 = vmatpush.bf16.xpose.msra.mxu1 %v2234_v40 }
 0x153   : > { %1436 = vmatpush.bf16.xpose.msra.mxu0 %v2256_v34 }
 0x157   : > { %1449 = vmatpush.bf16.xpose.msra.mxu1 %v2277_v41 }
 0x15b   : > { %1437 = vmatpush.bf16.xpose.msra.mxu0 %v2285_v16 }
 0x15f   : > { %1450 = vmatpush.bf16.xpose.msra.mxu1 %v2311_v43 }
 0x163   : > { %1438 = vmatpush.bf16.xpose.msra.mxu0 %v2331_v22 }
 0x164   : > { %v1290_v40 = vpop.f32.mrf.mxu2 }
 0x165   : > { %v1303_v34 = vpop.f32.mrf.mxu3 }
 0x167   : > { %1451 = vmatpush.bf16.xpose.msra.mxu1 %v2336_v3 }
 0x16b   : > { %1439 = vmatpush.bf16.xpose.msra.mxu0 %v2360_v46 }
 0x16c   : > { %v1292_v41 = vpop.f32.mrf.mxu2 }
 0x16d   : > { %v1305_v16 = vpop.f32.mrf.mxu3 }
 0x16f   : > { %1452 = vmatpush.bf16.xpose.msra.mxu1 %v2371_v5  ;;  %v1243_v43 = vpop.f32.mrf.mxu0 }
 0x170   : > { %v1260_v22 = vadd.f32 %v1243_v43, %v1197_v44 }
 0x172   : > { %1649 = vmatmul.msk.bf16.vlgmr.msra.gmra.mxu0 %vm663_vm0, %v1648_v29  ;;  %v1307_v3 = vadd.f32 %v1290_v40, %v1260_v22 }
 0x173   : > { %v1256_v47 = vpop.f32.mrf.mxu1 }
 0x174   : > { %v1261_v14 = vadd.f32 %v1256_v47, %v1198_v20 }
 0x176   : > { %1650 = vmatmul.msk.bf16.vlgmr.msra.gmra.mxu1 %vm663_vm0, %v1648_v29  ;;  %v1308_v46 = vadd.f32 %v1303_v34, %v1261_v14 }
 0x177   : > { %v1245_v61 = vpop.f32.mrf.mxu0 }
 0x17b   : > { %v1258_v5 = vpop.f32.mrf.mxu1 }
 0x1a4   : > { %v1394_v33 = vpop.f32.mrf.mxu2 }
 0x1a5   : > { %v1407_v1 = vpop.f32.mrf.mxu3 }
 0x1ac   : > { %v1396_v56 = vpop.f32.mrf.mxu2 }
 0x1ad   : > { %v1409_v0 = vpop.f32.mrf.mxu3 }
 0x1af   : > { %v1331_v28 = vpop.f32.mrf.mxu0 }
 0x1b0   : > { %v1348_v58 = vadd.f32 %v1331_v28, %v1307_v3 }
 0x1b2   : > { %v1411_v57 = vadd.f32 %v1394_v33, %v1348_v58 }
 0x1b3   : > { %v1344_v49 = vpop.f32.mrf.mxu1 }
 0x1b4   : > { %v1349_v19 = vadd.f32 %v1344_v49, %v1308_v46 }
 0x1b6   : > { %v1412_v45 = vadd.f32 %v1407_v1, %v1349_v19 }
 0x1b7   : > { %v1333_v48 = vpop.f32.mrf.mxu0 }
 0x1ba   : > { %v1464_v63 = vpop.permute.xlu0 %1463 }
 0x1bb   : > { %v1346_v21 = vpop.f32.mrf.mxu1 }
 0x1ef   : > { %v1441_v35 = vpop.f32.mrf.mxu0 }
 0x1f0   : > { %v1458_v51 = vadd.f32 %v1441_v35, %v1411_v57 }
 0x1f2   : > { %v1466_v62 = vadd.f32 %v1464_v63, %v1458_v51 }
 0x1f3   : > { %v1454_v53 = vpop.f32.mrf.mxu1 }
 0x1f4   : > { %v1459_v55 = vadd.f32 %v1454_v53, %v1412_v45  ;;  %v1468_v2 = vmax.f32 %v1466_v62, 0.0 }
 0x1f6   : > { %v1467_v12 = vadd.f32 %v1464_v63, %v1459_v55  ;;  %1470 = vst [vmem:[%s170_s16] sm:$0xff] %v1468_v2 }
 0x1f7   : > { %v1443_v8 = vpop.f32.mrf.mxu0 }
 0x1f8   : > { %v1469_v7 = vmax.f32 %v1467_v12, 0.0 }
 0x1fa   : > { %1471 = vst [vmem:[%s170_s16 + $0x8] sm:$0xff] %v1469_v7 }
 0x1fb   : > { %v1456_v27 = vpop.f32.mrf.mxu1 }
 0x1fc PF: > { %s13_s12 = sadd.s32 1, %s1689_s12  }
 0x1fd   : > { %p10_p4 = scmp.ge.s32.totalorder %s13_s12, 4  }
 0x1ff   :  { %12 = sbr.rel (!%p10_p4) target bundleno = 1 (0x1), region = 70 }

</bundles_post_ra>
